<compile_context>
chip_gen: v7x
topology: tpu7x:2x2x1
jax: 0.10.0
libtpu: 0.0.40
codegen_flags: <defaults>
</compile_context>

<pallas_src>
import functools

import jax
import jax.numpy as jnp
from jax.experimental import pallas as pl
from jax.experimental.pallas import tpu as pltpu


# ----------------------------- Model config -------------------------------- #

NUM_PROP = 8
NUM_SCAN = 16
NUM_ACTIONS = 4
SCAN_ENCODER_DIMS = [32, 16]
ACTOR_HIDDEN_DIMS = [64, 32]
PRIV_ENCODER_DIMS = [32, 16]
NUM_PRIV_LATENT = 8
NUM_HIST = 10                       # tsteps == 10 -> two Conv1d layers
CHANNEL = 10                        # channel_size in StateHistoryEncoder
PRIV_OUT = PRIV_ENCODER_DIMS[-1]    # priv_encoder_output_dim
SCAN_OUT = SCAN_ENCODER_DIMS[-1]
OBS_DIM = NUM_PROP + NUM_SCAN + NUM_PRIV_LATENT + NUM_HIST * NUM_PROP

PRIV_OFF = NUM_PROP + NUM_SCAN
HIST_OFF = OBS_DIM - NUM_HIST * NUM_PROP

# Conv pipeline for tsteps == 10:
#   Conv1d(30, 20, k=4, s=2) -> L: 10 -> 4 ;  Conv1d(20, 10, k=2, s=1) -> L: 4 -> 3
CONV1_K, CONV1_STRIDE = 4, 2
CONV2_K, CONV2_STRIDE = 2, 1
CONV1_LOUT = (NUM_HIST - CONV1_K) // CONV1_STRIDE + 1     # 4
CONV2_LOUT = (CONV1_LOUT - CONV2_K) // CONV2_STRIDE + 1   # 3

OUT_PAD = 128                       # lane-dense padded output width (sliced to 4 outside)


def _round_up(x, m):
    return ((x + m - 1) // m) * m


# ----------------------------- Fused Pallas kernel -------------------------- #

def _elu(y):
    # f32 epilogue; clamp keeps the unselected lane finite (no inf from exp of big +y).
    return jnp.where(y > 0.0, y, jnp.exp(jnp.minimum(y, 0.0)) - 1.0)


def _actor_fused_kernel(*refs, hist_encoding):
    o_ref = refs[-1]
    obs_ref = refs[0]
    wrefs = refs[1:-1]

    if hist_encoding:
        (w_s0, b_s0, w_s1, b_s1,
         w_he, b_he, w_c0, b_c0, w_c1, b_c1, w_ho, b_ho,
         w_a0_p, w_a0_s, w_a0_l, b_a0, w_a1, b_a1, w_a2, b_a2) = wrefs
    else:
        (w_s0, b_s0, w_s1, b_s1,
         w_p0, b_p0, w_p1, b_p1,
         w_a0_p, w_a0_s, w_a0_l, b_a0, w_a1, b_a1, w_a2, b_a2) = wrefs

    def fdot(a, w_ref):
        return jnp.dot(a, w_ref[...], preferred_element_type=jnp.float32)

    x = obs_ref[...]                                      # (BM, OBS_DIM) f32
    prop = x[:, :NUM_PROP]
    scan = x[:, NUM_PROP:NUM_PROP + NUM_SCAN]

    # ---- scan encoder: Linear+ELU, Linear+Tanh -----------------------------
    s = _elu(fdot(scan, w_s0) + b_s0[...])
    scan_latent = jnp.tanh(fdot(s, w_s1) + b_s1[...])

    # ---- latent: history encoder OR priv encoder ---------------------------
    if hist_encoding:
        # per-timestep projection Linear(num_prop, 30) + ELU (static unroll, T=10)
        projs = []
        for t in range(NUM_HIST):
            lo = HIST_OFF + t * NUM_PROP
            ht = x[:, lo:lo + NUM_PROP]                   # (BM, 8)
            projs.append(_elu(fdot(ht, w_he) + b_he[...]))  # (BM, 30)

        # Conv1d(30,20,k=4,s=2) + ELU, unrolled over output positions and taps
        c1 = []
        for l in range(CONV1_LOUT):
            acc = b_c0[...]                               # (1, 20)
            for k in range(CONV1_K):
                acc = acc + jnp.dot(projs[l * CONV1_STRIDE + k], w_c0[k],
                                    preferred_element_type=jnp.float32)
            c1.append(_elu(acc))                          # (BM, 20)

        # Conv1d(20,10,k=2,s=1) + ELU
        c2 = []
        for l in range(CONV2_LOUT):
            acc = b_c1[...]                               # (1, 10)
            for k in range(CONV2_K):
                acc = acc + jnp.dot(c1[l * CONV2_STRIDE + k], w_c1[k],
                                    preferred_element_type=jnp.float32)
            c2.append(_elu(acc))                          # (BM, 10)

        # nn.Flatten folded into Linear(30, priv_out): sum_l c2_l @ W_ho[l::L]
        acc = b_ho[...]
        for l in range(CONV2_LOUT):
            acc = acc + jnp.dot(c2[l], w_ho[l], preferred_element_type=jnp.float32)
        latent = _elu(acc)                                # (BM, 16)
    else:
        priv = x[:, PRIV_OFF:PRIV_OFF + NUM_PRIV_LATENT]
        h = _elu(fdot(priv, w_p0) + b_p0[...])
        latent = _elu(fdot(h, w_p1) + b_p1[...])          # (BM, 16)

    # ---- backbone: concat [prop, scan_latent, latent] folded via row-split W0
    h0 = _elu(fdot(prop, w_a0_p) + fdot(scan_latent, w_a0_s)
              + fdot(latent, w_a0_l) + b_a0[...])         # (BM, 64)
    h1 = _elu(fdot(h0, w_a1) + b_a1[...])                 # (BM, 32)
    out = fdot(h1, w_a2) + b_a2[...]                      # (BM, 128) lane-dense (padded)
    o_ref[...] = out.astype(o_ref.dtype)


# ----------------------------- Parameter plumbing --------------------------- #

def init_params(key):
    """Deterministic synthetic parameters (shapes mirror the PyTorch __init__)."""
    p = {}

    def lin(k, fan_in, fan_out):
        kw, kb = jax.random.split(k)
        w = jax.random.normal(kw, (fan_in, fan_out), jnp.float32) / jnp.sqrt(fan_in)
        b = jax.random.normal(kb, (fan_out,), jnp.float32) * 0.01
        return w, b

    def conv(k, cout, cin, ksz):
        kw, kb = jax.random.split(k)
        w = jax.random.normal(kw, (cout, cin, ksz), jnp.float32) / jnp.sqrt(cin * ksz)
        b = jax.random.normal(kb, (cout,), jnp.float32) * 0.01
        return w, b

    keys = jax.random.split(key, 16)
    p["priv0"] = lin(keys[0], NUM_PRIV_LATENT, PRIV_ENCODER_DIMS[0])
    p["priv1"] = lin(keys[1], PRIV_ENCODER_DIMS[0], PRIV_ENCODER_DIMS[1])
    p["hist_enc"] = lin(keys[2], NUM_PROP, 3 * CHANNEL)                  # Linear(num_prop, 30)
    p["hist_conv0"] = conv(keys[3], 2 * CHANNEL, 3 * CHANNEL, CONV1_K)   # Conv1d(30,20,4,s=2)
    p["hist_conv1"] = conv(keys[4], CHANNEL, 2 * CHANNEL, CONV2_K)       # Conv1d(20,10,2,s=1)
    p["hist_out"] = lin(keys[5], 3 * CHANNEL, PRIV_OUT)                  # Linear(30, priv_out)
    p["scan0"] = lin(keys[6], NUM_SCAN, SCAN_ENCODER_DIMS[0])
    p["scan1"] = lin(keys[7], SCAN_ENCODER_DIMS[0], SCAN_ENCODER_DIMS[1])
    in0 = NUM_PROP + SCAN_OUT + PRIV_OUT
    p["act0"] = lin(keys[8], in0, ACTOR_HIDDEN_DIMS[0])
    p["act1"] = lin(keys[9], ACTOR_HIDDEN_DIMS[0], ACTOR_HIDDEN_DIMS[1])
    p["act2"] = lin(keys[10], ACTOR_HIDDEN_DIMS[1], NUM_ACTIONS)
    return p


def _prepare_kernel_params(p, hist_encoding):
    """Re-layout PyTorch-style params for the fused kernel (transposed conv taps,
    folded flatten, row-split backbone W0, lane-padded final layer)."""
    r2 = lambda b: b.reshape(1, -1)
    ws0, bs0 = p["scan0"]; ws1, bs1 = p["scan1"]
    wa0, ba0 = p["act0"]; wa1, ba1 = p["act1"]; wa2, ba2 = p["act2"]

    wa0_p = wa0[:NUM_PROP]
    wa0_s = wa0[NUM_PROP:NUM_PROP + SCAN_OUT]
    wa0_l = wa0[NUM_PROP + SCAN_OUT:]
    wa2_pad = jnp.pad(wa2, ((0, 0), (0, OUT_PAD - NUM_ACTIONS)))
    ba2_pad = jnp.pad(ba2, (0, OUT_PAD - NUM_ACTIONS)).reshape(1, -1)

    tail = [wa0_p, wa0_s, wa0_l, r2(ba0), wa1, r2(ba1), wa2_pad, ba2_pad]

    if hist_encoding:
        whe, bhe = p["hist_enc"]
        wc0, bc0 = p["hist_conv0"]                        # (Cout=20, Cin=30, K=4)
        wc1, bc1 = p["hist_conv1"]                        # (Cout=10, Cin=20, K=2)
        who, bho = p["hist_out"]                          # (30, 16)
        wc0_t = jnp.transpose(wc0, (2, 1, 0))             # (K, Cin, Cout)
        wc1_t = jnp.transpose(wc1, (2, 1, 0))
        # Fold nn.Flatten (flat index = channel*L + position) into the output linear.
        who_t = jnp.stack([who[l::CONV2_LOUT, :] for l in range(CONV2_LOUT)], axis=0)
        return [ws0, r2(bs0), ws1, r2(bs1),
                whe, r2(bhe), wc0_t, r2(bc0), wc1_t, r2(bc1), who_t, r2(bho)] + tail

    wp0, bp0 = p["priv0"]; wp1, bp1 = p["priv1"]
    return [ws0, r2(bs0), ws1, r2(bs1), wp0, r2(bp0), wp1, r2(bp1)] + tail


# ----------------------------- Wrapper (single pallas_call) ----------------- #

def actor_forward_pallas(params, obs, hist_encoding, block_m=256):
    # TODO(synk): scandots_latent / eval overrides of the PyTorch forward are not exposed.
    B = obs.shape[0]
    kparams = _prepare_kernel_params(params, hist_encoding)

    bm = block_m if B >= block_m else _round_up(max(B, 1), 8)
    Bp = _round_up(B, bm)
    if Bp != B:
        obs = jnp.pad(obs, ((0, Bp - B), (0, 0)))
    grid = (Bp // bm,)

    in_specs = [pl.BlockSpec((bm, OBS_DIM), lambda i: (i, 0))]
    for arr in kparams:
        nd = arr.ndim
        in_specs.append(pl.BlockSpec(arr.shape, lambda i, nd=nd: (0,) * nd))

    out = pl.pallas_call(
        functools.partial(_actor_fused_kernel, hist_encoding=hist_encoding),
        out_shape=jax.ShapeDtypeStruct((Bp, OUT_PAD), jnp.float32),
        grid=grid,
        in_specs=in_specs,
        out_specs=pl.BlockSpec((bm, OUT_PAD), lambda i: (i, 0)),
        compiler_params=pltpu.CompilerParams(
            dimension_semantics=("parallel",),
            vmem_limit_bytes=32 * 1024 * 1024,
        ),
    )(obs, *kparams)
    return out[:B, :NUM_ACTIONS]


# ----------------------------- Pure-JAX reference --------------------------- #

def _ref_act(y, act):
    if act == "elu":
        return jnp.where(y > 0.0, y, jnp.expm1(y))
    if act == "tanh":
        return jnp.tanh(y)
    return y


def _ref_linear(x, wb, act):
    w, b = wb
    return _ref_act(x @ w + b[None, :], act)


def _ref_conv1d(x, wb, stride, act):
    w, b = wb
    N, Cin, L = x.shape
    Cout, _, K = w.shape
    Lout = (L - K) // stride + 1
    idx = jnp.arange(Lout)[:, None] * stride + jnp.arange(K)[None, :]
    patches = jnp.transpose(x[:, :, idx], (0, 2, 1, 3)).reshape(N * Lout, Cin * K)
    wmat = jnp.transpose(w, (1, 2, 0)).reshape(Cin * K, Cout)
    y = _ref_act(patches @ wmat + b[None, :], act)
    return jnp.transpose(y.reshape(N, Lout, Cout), (0, 2, 1))


def actor_forward_ref(params, obs, hist_encoding):
    prop = obs[:, :NUM_PROP]
    scan = obs[:, NUM_PROP:NUM_PROP + NUM_SCAN]
    s = _ref_linear(scan, params["scan0"], "elu")
    scan_latent = _ref_linear(s, params["scan1"], "tanh")

    if hist_encoding:
        hist = obs[:, -NUM_HIST * NUM_PROP:].reshape(-1, NUM_HIST, NUM_PROP)
        nd = hist.shape[0]
        proj = _ref_linear(hist.reshape(nd * NUM_HIST, NUM_PROP), params["hist_enc"], "elu")
        xc = jnp.transpose(proj.reshape(nd, NUM_HIST, 3 * CHANNEL), (0, 2, 1))
        xc = _ref_conv1d(xc, params["hist_conv0"], CONV1_STRIDE, "elu")
        xc = _ref_conv1d(xc, params["hist_conv1"], CONV2_STRIDE, "elu")
        latent = _ref_linear(xc.reshape(nd, -1), params["hist_out"], "elu")
    else:
        priv = obs[:, PRIV_OFF:PRIV_OFF + NUM_PRIV_LATENT]
        h = _ref_linear(priv, params["priv0"], "elu")
        latent = _ref_linear(h, params["priv1"], "elu")

    x = jnp.concatenate([prop, scan_latent, latent], axis=1)
    x = _ref_linear(x, params["act0"], "elu")
    x = _ref_linear(x, params["act1"], "elu")
    return _ref_linear(x, params["act2"], "none")


# ---------------------------------- main ------------------------------------ #

if __name__ == "__main__":
    key = jax.random.PRNGKey(0)
    kp, kx, kx2 = jax.random.split(key, 3)
    params = init_params(kp)

    fwd = jax.jit(actor_forward_pallas, static_argnums=(2,))

    # Small batch (grid = 1 after padding to 8 rows).
    batch = 4
    obs = jax.random.normal(kx, (batch, OBS_DIM), jnp.float32)
    out_hist = fwd(params, obs, True)
    out_priv = fwd(params, obs, False)
    jax.block_until_ready(out_hist)
    jax.block_until_ready(out_priv)

    ref_hist = actor_forward_ref(params, obs, True)
    ref_priv = actor_forward_ref(params, obs, False)
    assert out_hist.shape == (batch, NUM_ACTIONS)
    assert out_priv.shape == (batch, NUM_ACTIONS)
    assert jnp.allclose(out_hist, ref_hist, atol=1e-5, rtol=1e-5)
    assert jnp.allclose(out_priv, ref_priv, atol=1e-5, rtol=1e-5)

    # Larger batch exercising the batch-tiled "parallel" grid (2 blocks of 256).
    big = 512
    obs_big = jax.random.normal(kx2, (big, OBS_DIM), jnp.float32)
    out_big = fwd(params, obs_big, True)
    jax.block_until_ready(out_big)
    ref_big = actor_forward_ref(params, obs_big, True)
    assert out_big.shape == (big, NUM_ACTIONS)
    assert jnp.allclose(out_big, ref_big, atol=1e-5, rtol=1e-5)

    print("KERNEL_OK")
</pallas_src>

<mosaic_0001>
module attributes {stable_mosaic.version = 11 : i64} {
  func.func @_actor_fused_kernel(%arg0: i32, %arg1: memref<8x112xf32, #tpu.memory_space<vmem>>, %arg2: memref<16x32xf32, #tpu.memory_space<vmem>>, %arg3: memref<1x32xf32, #tpu.memory_space<vmem>>, %arg4: memref<32x16xf32, #tpu.memory_space<vmem>>, %arg5: memref<1x16xf32, #tpu.memory_space<vmem>>, %arg6: memref<8x30xf32, #tpu.memory_space<vmem>>, %arg7: memref<1x30xf32, #tpu.memory_space<vmem>>, %arg8: memref<4x30x20xf32, #tpu.memory_space<vmem>>, %arg9: memref<1x20xf32, #tpu.memory_space<vmem>>, %arg10: memref<2x20x10xf32, #tpu.memory_space<vmem>>, %arg11: memref<1x10xf32, #tpu.memory_space<vmem>>, %arg12: memref<3x10x16xf32, #tpu.memory_space<vmem>>, %arg13: memref<1x16xf32, #tpu.memory_space<vmem>>, %arg14: memref<8x64xf32, #tpu.memory_space<vmem>>, %arg15: memref<16x64xf32, #tpu.memory_space<vmem>>, %arg16: memref<16x64xf32, #tpu.memory_space<vmem>>, %arg17: memref<1x64xf32, #tpu.memory_space<vmem>>, %arg18: memref<64x32xf32, #tpu.memory_space<vmem>>, %arg19: memref<1x32xf32, #tpu.memory_space<vmem>>, %arg20: memref<32x128xf32, #tpu.memory_space<vmem>>, %arg21: memref<1x128xf32, #tpu.memory_space<vmem>>, %arg22: memref<8x128xf32, #tpu.memory_space<vmem>>) attributes {dimension_semantics = [#tpu.dimension_semantics<parallel>], iteration_bounds = array<i64: 1>, scalar_prefetch = 0 : i64, scratch_operands = 0 : i64, tpu.core_type = #tpu.core_type<tc>, window_params = [{transform_indices = @transform_0, window_bounds = array<i64: 8, 112>}, {pipeline_mode = #tpu.pipeline_mode<synchronous>, transform_indices = @transform_1, window_bounds = array<i64: 16, 32>}, {pipeline_mode = #tpu.pipeline_mode<synchronous>, transform_indices = @transform_2, window_bounds = array<i64: 1, 32>}, {pipeline_mode = #tpu.pipeline_mode<synchronous>, transform_indices = @transform_3, window_bounds = array<i64: 32, 16>}, {pipeline_mode = #tpu.pipeline_mode<synchronous>, transform_indices = @transform_4, window_bounds = array<i64: 1, 16>}, {pipeline_mode = #tpu.pipeline_mode<synchronous>, transform_indices = @transform_5, window_bounds = array<i64: 8, 30>}, {pipeline_mode = #tpu.pipeline_mode<synchronous>, transform_indices = @transform_6, window_bounds = array<i64: 1, 30>}, {pipeline_mode = #tpu.pipeline_mode<synchronous>, transform_indices = @transform_7, window_bounds = array<i64: 4, 30, 20>}, {pipeline_mode = #tpu.pipeline_mode<synchronous>, transform_indices = @transform_8, window_bounds = array<i64: 1, 20>}, {pipeline_mode = #tpu.pipeline_mode<synchronous>, transform_indices = @transform_9, window_bounds = array<i64: 2, 20, 10>}, {pipeline_mode = #tpu.pipeline_mode<synchronous>, transform_indices = @transform_10, window_bounds = array<i64: 1, 10>}, {pipeline_mode = #tpu.pipeline_mode<synchronous>, transform_indices = @transform_11, window_bounds = array<i64: 3, 10, 16>}, {pipeline_mode = #tpu.pipeline_mode<synchronous>, transform_indices = @transform_12, window_bounds = array<i64: 1, 16>}, {pipeline_mode = #tpu.pipeline_mode<synchronous>, transform_indices = @transform_13, window_bounds = array<i64: 8, 64>}, {pipeline_mode = #tpu.pipeline_mode<synchronous>, transform_indices = @transform_14, window_bounds = array<i64: 16, 64>}, {pipeline_mode = #tpu.pipeline_mode<synchronous>, transform_indices = @transform_15, window_bounds = array<i64: 16, 64>}, {pipeline_mode = #tpu.pipeline_mode<synchronous>, transform_indices = @transform_16, window_bounds = array<i64: 1, 64>}, {pipeline_mode = #tpu.pipeline_mode<synchronous>, transform_indices = @transform_17, window_bounds = array<i64: 64, 32>}, {pipeline_mode = #tpu.pipeline_mode<synchronous>, transform_indices = @transform_18, window_bounds = array<i64: 1, 32>}, {pipeline_mode = #tpu.pipeline_mode<synchronous>, transform_indices = @transform_19, window_bounds = array<i64: 32, 128>}, {pipeline_mode = #tpu.pipeline_mode<synchronous>, transform_indices = @transform_20, window_bounds = array<i64: 1, 128>}, {transform_indices = @transform_21, window_bounds = array<i64: 8, 128>}]} {
    %c0 = arith.constant 0 : index
    %c0_0 = arith.constant 0 : index
    %0 = vector.load %arg1[%c0, %c0_0] : memref<8x112xf32, #tpu.memory_space<vmem>>, vector<8x112xf32>
    %1 = vector.extract_strided_slice %0 {offsets = [0, 0], sizes = [8, 8], strides = [1, 1]} : vector<8x112xf32> to vector<8x8xf32>
    %2 = vector.extract_strided_slice %0 {offsets = [0, 8], sizes = [8, 16], strides = [1, 1]} : vector<8x112xf32> to vector<8x16xf32>
    %c0_1 = arith.constant 0 : index
    %c0_2 = arith.constant 0 : index
    %3 = vector.load %arg2[%c0_1, %c0_2] : memref<16x32xf32, #tpu.memory_space<vmem>>, vector<16x32xf32>
    %cst = arith.constant dense<0.000000e+00> : vector<8x32xf32>
    %4 = tpu.matmul %2, %3, %cst {dimension_numbers = #tpu.dot_dimension_numbers<[1], [0], [0], [1], [0, 0, 1, 1], [], []>} : vector<8x16xf32>, vector<16x32xf32>, vector<8x32xf32> -> vector<8x32xf32>
    %c0_3 = arith.constant 0 : index
    %c0_4 = arith.constant 0 : index
    %5 = vector.load %arg3[%c0_3, %c0_4] : memref<1x32xf32, #tpu.memory_space<vmem>>, vector<1x32xf32>
    %6 = vector.broadcast %5 : vector<1x32xf32> to vector<8x32xf32>
    %7 = arith.addf %4, %6 : vector<8x32xf32>
    %cst_5 = arith.constant 0.000000e+00 : f32
    %8 = vector.broadcast %cst_5 : f32 to vector<8x32xf32>
    %9 = arith.cmpf ogt, %7, %8 : vector<8x32xf32>
    %cst_6 = arith.constant 0.000000e+00 : f32
    %10 = vector.broadcast %cst_6 : f32 to vector<8x32xf32>
    %11 = arith.minimumf %7, %10 : vector<8x32xf32>
    %12 = math.exp %11 : vector<8x32xf32>
    %cst_7 = arith.constant 1.000000e+00 : f32
    %13 = vector.broadcast %cst_7 : f32 to vector<8x32xf32>
    %14 = arith.subf %12, %13 : vector<8x32xf32>
    %15 = arith.select %9, %7, %14 : vector<8x32xi1>, vector<8x32xf32>
    %c0_8 = arith.constant 0 : index
    %c0_9 = arith.constant 0 : index
    %16 = vector.load %arg4[%c0_8, %c0_9] : memref<32x16xf32, #tpu.memory_space<vmem>>, vector<32x16xf32>
    %cst_10 = arith.constant dense<0.000000e+00> : vector<8x16xf32>
    %17 = tpu.matmul %15, %16, %cst_10 {dimension_numbers = #tpu.dot_dimension_numbers<[1], [0], [0], [1], [0, 0, 1, 1], [], []>} : vector<8x32xf32>, vector<32x16xf32>, vector<8x16xf32> -> vector<8x16xf32>
    %c0_11 = arith.constant 0 : index
    %c0_12 = arith.constant 0 : index
    %18 = vector.load %arg5[%c0_11, %c0_12] : memref<1x16xf32, #tpu.memory_space<vmem>>, vector<1x16xf32>
    %19 = vector.broadcast %18 : vector<1x16xf32> to vector<8x16xf32>
    %20 = arith.addf %17, %19 : vector<8x16xf32>
    %21 = math.tanh %20 : vector<8x16xf32>
    %22 = vector.extract_strided_slice %0 {offsets = [0, 32], sizes = [8, 8], strides = [1, 1]} : vector<8x112xf32> to vector<8x8xf32>
    %c0_13 = arith.constant 0 : index
    %c0_14 = arith.constant 0 : index
    %23 = vector.load %arg6[%c0_13, %c0_14] : memref<8x30xf32, #tpu.memory_space<vmem>>, vector<8x30xf32>
    %cst_15 = arith.constant dense<0.000000e+00> : vector<8x30xf32>
    %24 = tpu.matmul %22, %23, %cst_15 {dimension_numbers = #tpu.dot_dimension_numbers<[1], [0], [0], [1], [0, 0, 1, 1], [], []>} : vector<8x8xf32>, vector<8x30xf32>, vector<8x30xf32> -> vector<8x30xf32>
    %c0_16 = arith.constant 0 : index
    %c0_17 = arith.constant 0 : index
    %25 = vector.load %arg7[%c0_16, %c0_17] : memref<1x30xf32, #tpu.memory_space<vmem>>, vector<1x30xf32>
    %26 = vector.broadcast %25 : vector<1x30xf32> to vector<8x30xf32>
    %27 = arith.addf %24, %26 : vector<8x30xf32>
    %cst_18 = arith.constant 0.000000e+00 : f32
    %28 = vector.broadcast %cst_18 : f32 to vector<8x30xf32>
    %29 = arith.cmpf ogt, %27, %28 : vector<8x30xf32>
    %cst_19 = arith.constant 0.000000e+00 : f32
    %30 = vector.broadcast %cst_19 : f32 to vector<8x30xf32>
    %31 = arith.minimumf %27, %30 : vector<8x30xf32>
    %32 = math.exp %31 : vector<8x30xf32>
    %cst_20 = arith.constant 1.000000e+00 : f32
    %33 = vector.broadcast %cst_20 : f32 to vector<8x30xf32>
    %34 = arith.subf %32, %33 : vector<8x30xf32>
    %35 = arith.select %29, %27, %34 : vector<8x30xi1>, vector<8x30xf32>
    %36 = vector.extract_strided_slice %0 {offsets = [0, 40], sizes = [8, 8], strides = [1, 1]} : vector<8x112xf32> to vector<8x8xf32>
    %c0_21 = arith.constant 0 : index
    %c0_22 = arith.constant 0 : index
    %37 = vector.load %arg6[%c0_21, %c0_22] : memref<8x30xf32, #tpu.memory_space<vmem>>, vector<8x30xf32>
    %cst_23 = arith.constant dense<0.000000e+00> : vector<8x30xf32>
    %38 = tpu.matmul %36, %37, %cst_23 {dimension_numbers = #tpu.dot_dimension_numbers<[1], [0], [0], [1], [0, 0, 1, 1], [], []>} : vector<8x8xf32>, vector<8x30xf32>, vector<8x30xf32> -> vector<8x30xf32>
    %c0_24 = arith.constant 0 : index
    %c0_25 = arith.constant 0 : index
    %39 = vector.load %arg7[%c0_24, %c0_25] : memref<1x30xf32, #tpu.memory_space<vmem>>, vector<1x30xf32>
    %40 = vector.broadcast %39 : vector<1x30xf32> to vector<8x30xf32>
    %41 = arith.addf %38, %40 : vector<8x30xf32>
    %cst_26 = arith.constant 0.000000e+00 : f32
    %42 = vector.broadcast %cst_26 : f32 to vector<8x30xf32>
    %43 = arith.cmpf ogt, %41, %42 : vector<8x30xf32>
    %cst_27 = arith.constant 0.000000e+00 : f32
    %44 = vector.broadcast %cst_27 : f32 to vector<8x30xf32>
    %45 = arith.minimumf %41, %44 : vector<8x30xf32>
    %46 = math.exp %45 : vector<8x30xf32>
    %cst_28 = arith.constant 1.000000e+00 : f32
    %47 = vector.broadcast %cst_28 : f32 to vector<8x30xf32>
    %48 = arith.subf %46, %47 : vector<8x30xf32>
    %49 = arith.select %43, %41, %48 : vector<8x30xi1>, vector<8x30xf32>
    %50 = vector.extract_strided_slice %0 {offsets = [0, 48], sizes = [8, 8], strides = [1, 1]} : vector<8x112xf32> to vector<8x8xf32>
    %c0_29 = arith.constant 0 : index
    %c0_30 = arith.constant 0 : index
    %51 = vector.load %arg6[%c0_29, %c0_30] : memref<8x30xf32, #tpu.memory_space<vmem>>, vector<8x30xf32>
    %cst_31 = arith.constant dense<0.000000e+00> : vector<8x30xf32>
    %52 = tpu.matmul %50, %51, %cst_31 {dimension_numbers = #tpu.dot_dimension_numbers<[1], [0], [0], [1], [0, 0, 1, 1], [], []>} : vector<8x8xf32>, vector<8x30xf32>, vector<8x30xf32> -> vector<8x30xf32>
    %c0_32 = arith.constant 0 : index
    %c0_33 = arith.constant 0 : index
    %53 = vector.load %arg7[%c0_32, %c0_33] : memref<1x30xf32, #tpu.memory_space<vmem>>, vector<1x30xf32>
    %54 = vector.broadcast %53 : vector<1x30xf32> to vector<8x30xf32>
    %55 = arith.addf %52, %54 : vector<8x30xf32>
    %cst_34 = arith.constant 0.000000e+00 : f32
    %56 = vector.broadcast %cst_34 : f32 to vector<8x30xf32>
    %57 = arith.cmpf ogt, %55, %56 : vector<8x30xf32>
    %cst_35 = arith.constant 0.000000e+00 : f32
    %58 = vector.broadcast %cst_35 : f32 to vector<8x30xf32>
    %59 = arith.minimumf %55, %58 : vector<8x30xf32>
    %60 = math.exp %59 : vector<8x30xf32>
    %cst_36 = arith.constant 1.000000e+00 : f32
    %61 = vector.broadcast %cst_36 : f32 to vector<8x30xf32>
    %62 = arith.subf %60, %61 : vector<8x30xf32>
    %63 = arith.select %57, %55, %62 : vector<8x30xi1>, vector<8x30xf32>
    %64 = vector.extract_strided_slice %0 {offsets = [0, 56], sizes = [8, 8], strides = [1, 1]} : vector<8x112xf32> to vector<8x8xf32>
    %c0_37 = arith.constant 0 : index
    %c0_38 = arith.constant 0 : index
    %65 = vector.load %arg6[%c0_37, %c0_38] : memref<8x30xf32, #tpu.memory_space<vmem>>, vector<8x30xf32>
    %cst_39 = arith.constant dense<0.000000e+00> : vector<8x30xf32>
    %66 = tpu.matmul %64, %65, %cst_39 {dimension_numbers = #tpu.dot_dimension_numbers<[1], [0], [0], [1], [0, 0, 1, 1], [], []>} : vector<8x8xf32>, vector<8x30xf32>, vector<8x30xf32> -> vector<8x30xf32>
    %c0_40 = arith.constant 0 : index
    %c0_41 = arith.constant 0 : index
    %67 = vector.load %arg7[%c0_40, %c0_41] : memref<1x30xf32, #tpu.memory_space<vmem>>, vector<1x30xf32>
    %68 = vector.broadcast %67 : vector<1x30xf32> to vector<8x30xf32>
    %69 = arith.addf %66, %68 : vector<8x30xf32>
    %cst_42 = arith.constant 0.000000e+00 : f32
    %70 = vector.broadcast %cst_42 : f32 to vector<8x30xf32>
    %71 = arith.cmpf ogt, %69, %70 : vector<8x30xf32>
    %cst_43 = arith.constant 0.000000e+00 : f32
    %72 = vector.broadcast %cst_43 : f32 to vector<8x30xf32>
    %73 = arith.minimumf %69, %72 : vector<8x30xf32>
    %74 = math.exp %73 : vector<8x30xf32>
    %cst_44 = arith.constant 1.000000e+00 : f32
    %75 = vector.broadcast %cst_44 : f32 to vector<8x30xf32>
    %76 = arith.subf %74, %75 : vector<8x30xf32>
    %77 = arith.select %71, %69, %76 : vector<8x30xi1>, vector<8x30xf32>
    %78 = vector.extract_strided_slice %0 {offsets = [0, 64], sizes = [8, 8], strides = [1, 1]} : vector<8x112xf32> to vector<8x8xf32>
    %c0_45 = arith.constant 0 : index
    %c0_46 = arith.constant 0 : index
    %79 = vector.load %arg6[%c0_45, %c0_46] : memref<8x30xf32, #tpu.memory_space<vmem>>, vector<8x30xf32>
    %cst_47 = arith.constant dense<0.000000e+00> : vector<8x30xf32>
    %80 = tpu.matmul %78, %79, %cst_47 {dimension_numbers = #tpu.dot_dimension_numbers<[1], [0], [0], [1], [0, 0, 1, 1], [], []>} : vector<8x8xf32>, vector<8x30xf32>, vector<8x30xf32> -> vector<8x30xf32>
    %c0_48 = arith.constant 0 : index
    %c0_49 = arith.constant 0 : index
    %81 = vector.load %arg7[%c0_48, %c0_49] : memref<1x30xf32, #tpu.memory_space<vmem>>, vector<1x30xf32>
    %82 = vector.broadcast %81 : vector<1x30xf32> to vector<8x30xf32>
    %83 = arith.addf %80, %82 : vector<8x30xf32>
    %cst_50 = arith.constant 0.000000e+00 : f32
    %84 = vector.broadcast %cst_50 : f32 to vector<8x30xf32>
    %85 = arith.cmpf ogt, %83, %84 : vector<8x30xf32>
    %cst_51 = arith.constant 0.000000e+00 : f32
    %86 = vector.broadcast %cst_51 : f32 to vector<8x30xf32>
    %87 = arith.minimumf %83, %86 : vector<8x30xf32>
    %88 = math.exp %87 : vector<8x30xf32>
    %cst_52 = arith.constant 1.000000e+00 : f32
    %89 = vector.broadcast %cst_52 : f32 to vector<8x30xf32>
    %90 = arith.subf %88, %89 : vector<8x30xf32>
    %91 = arith.select %85, %83, %90 : vector<8x30xi1>, vector<8x30xf32>
    %92 = vector.extract_strided_slice %0 {offsets = [0, 72], sizes = [8, 8], strides = [1, 1]} : vector<8x112xf32> to vector<8x8xf32>
    %c0_53 = arith.constant 0 : index
    %c0_54 = arith.constant 0 : index
    %93 = vector.load %arg6[%c0_53, %c0_54] : memref<8x30xf32, #tpu.memory_space<vmem>>, vector<8x30xf32>
    %cst_55 = arith.constant dense<0.000000e+00> : vector<8x30xf32>
    %94 = tpu.matmul %92, %93, %cst_55 {dimension_numbers = #tpu.dot_dimension_numbers<[1], [0], [0], [1], [0, 0, 1, 1], [], []>} : vector<8x8xf32>, vector<8x30xf32>, vector<8x30xf32> -> vector<8x30xf32>
    %c0_56 = arith.constant 0 : index
    %c0_57 = arith.constant 0 : index
    %95 = vector.load %arg7[%c0_56, %c0_57] : memref<1x30xf32, #tpu.memory_space<vmem>>, vector<1x30xf32>
    %96 = vector.broadcast %95 : vector<1x30xf32> to vector<8x30xf32>
    %97 = arith.addf %94, %96 : vector<8x30xf32>
    %cst_58 = arith.constant 0.000000e+00 : f32
    %98 = vector.broadcast %cst_58 : f32 to vector<8x30xf32>
    %99 = arith.cmpf ogt, %97, %98 : vector<8x30xf32>
    %cst_59 = arith.constant 0.000000e+00 : f32
    %100 = vector.broadcast %cst_59 : f32 to vector<8x30xf32>
    %101 = arith.minimumf %97, %100 : vector<8x30xf32>
    %102 = math.exp %101 : vector<8x30xf32>
    %cst_60 = arith.constant 1.000000e+00 : f32
    %103 = vector.broadcast %cst_60 : f32 to vector<8x30xf32>
    %104 = arith.subf %102, %103 : vector<8x30xf32>
    %105 = arith.select %99, %97, %104 : vector<8x30xi1>, vector<8x30xf32>
    %106 = vector.extract_strided_slice %0 {offsets = [0, 80], sizes = [8, 8], strides = [1, 1]} : vector<8x112xf32> to vector<8x8xf32>
    %c0_61 = arith.constant 0 : index
    %c0_62 = arith.constant 0 : index
    %107 = vector.load %arg6[%c0_61, %c0_62] : memref<8x30xf32, #tpu.memory_space<vmem>>, vector<8x30xf32>
    %cst_63 = arith.constant dense<0.000000e+00> : vector<8x30xf32>
    %108 = tpu.matmul %106, %107, %cst_63 {dimension_numbers = #tpu.dot_dimension_numbers<[1], [0], [0], [1], [0, 0, 1, 1], [], []>} : vector<8x8xf32>, vector<8x30xf32>, vector<8x30xf32> -> vector<8x30xf32>
    %c0_64 = arith.constant 0 : index
    %c0_65 = arith.constant 0 : index
    %109 = vector.load %arg7[%c0_64, %c0_65] : memref<1x30xf32, #tpu.memory_space<vmem>>, vector<1x30xf32>
    %110 = vector.broadcast %109 : vector<1x30xf32> to vector<8x30xf32>
    %111 = arith.addf %108, %110 : vector<8x30xf32>
    %cst_66 = arith.constant 0.000000e+00 : f32
    %112 = vector.broadcast %cst_66 : f32 to vector<8x30xf32>
    %113 = arith.cmpf ogt, %111, %112 : vector<8x30xf32>
    %cst_67 = arith.constant 0.000000e+00 : f32
    %114 = vector.broadcast %cst_67 : f32 to vector<8x30xf32>
    %115 = arith.minimumf %111, %114 : vector<8x30xf32>
    %116 = math.exp %115 : vector<8x30xf32>
    %cst_68 = arith.constant 1.000000e+00 : f32
    %117 = vector.broadcast %cst_68 : f32 to vector<8x30xf32>
    %118 = arith.subf %116, %117 : vector<8x30xf32>
    %119 = arith.select %113, %111, %118 : vector<8x30xi1>, vector<8x30xf32>
    %120 = vector.extract_strided_slice %0 {offsets = [0, 88], sizes = [8, 8], strides = [1, 1]} : vector<8x112xf32> to vector<8x8xf32>
    %c0_69 = arith.constant 0 : index
    %c0_70 = arith.constant 0 : index
    %121 = vector.load %arg6[%c0_69, %c0_70] : memref<8x30xf32, #tpu.memory_space<vmem>>, vector<8x30xf32>
    %cst_71 = arith.constant dense<0.000000e+00> : vector<8x30xf32>
    %122 = tpu.matmul %120, %121, %cst_71 {dimension_numbers = #tpu.dot_dimension_numbers<[1], [0], [0], [1], [0, 0, 1, 1], [], []>} : vector<8x8xf32>, vector<8x30xf32>, vector<8x30xf32> -> vector<8x30xf32>
    %c0_72 = arith.constant 0 : index
    %c0_73 = arith.constant 0 : index
    %123 = vector.load %arg7[%c0_72, %c0_73] : memref<1x30xf32, #tpu.memory_space<vmem>>, vector<1x30xf32>
    %124 = vector.broadcast %123 : vector<1x30xf32> to vector<8x30xf32>
    %125 = arith.addf %122, %124 : vector<8x30xf32>
    %cst_74 = arith.constant 0.000000e+00 : f32
    %126 = vector.broadcast %cst_74 : f32 to vector<8x30xf32>
    %127 = arith.cmpf ogt, %125, %126 : vector<8x30xf32>
    %cst_75 = arith.constant 0.000000e+00 : f32
    %128 = vector.broadcast %cst_75 : f32 to vector<8x30xf32>
    %129 = arith.minimumf %125, %128 : vector<8x30xf32>
    %130 = math.exp %129 : vector<8x30xf32>
    %cst_76 = arith.constant 1.000000e+00 : f32
    %131 = vector.broadcast %cst_76 : f32 to vector<8x30xf32>
    %132 = arith.subf %130, %131 : vector<8x30xf32>
    %133 = arith.select %127, %125, %132 : vector<8x30xi1>, vector<8x30xf32>
    %134 = vector.extract_strided_slice %0 {offsets = [0, 96], sizes = [8, 8], strides = [1, 1]} : vector<8x112xf32> to vector<8x8xf32>
    %c0_77 = arith.constant 0 : index
    %c0_78 = arith.constant 0 : index
    %135 = vector.load %arg6[%c0_77, %c0_78] : memref<8x30xf32, #tpu.memory_space<vmem>>, vector<8x30xf32>
    %cst_79 = arith.constant dense<0.000000e+00> : vector<8x30xf32>
    %136 = tpu.matmul %134, %135, %cst_79 {dimension_numbers = #tpu.dot_dimension_numbers<[1], [0], [0], [1], [0, 0, 1, 1], [], []>} : vector<8x8xf32>, vector<8x30xf32>, vector<8x30xf32> -> vector<8x30xf32>
    %c0_80 = arith.constant 0 : index
    %c0_81 = arith.constant 0 : index
    %137 = vector.load %arg7[%c0_80, %c0_81] : memref<1x30xf32, #tpu.memory_space<vmem>>, vector<1x30xf32>
    %138 = vector.broadcast %137 : vector<1x30xf32> to vector<8x30xf32>
    %139 = arith.addf %136, %138 : vector<8x30xf32>
    %cst_82 = arith.constant 0.000000e+00 : f32
    %140 = vector.broadcast %cst_82 : f32 to vector<8x30xf32>
    %141 = arith.cmpf ogt, %139, %140 : vector<8x30xf32>
    %cst_83 = arith.constant 0.000000e+00 : f32
    %142 = vector.broadcast %cst_83 : f32 to vector<8x30xf32>
    %143 = arith.minimumf %139, %142 : vector<8x30xf32>
    %144 = math.exp %143 : vector<8x30xf32>
    %cst_84 = arith.constant 1.000000e+00 : f32
    %145 = vector.broadcast %cst_84 : f32 to vector<8x30xf32>
    %146 = arith.subf %144, %145 : vector<8x30xf32>
    %147 = arith.select %141, %139, %146 : vector<8x30xi1>, vector<8x30xf32>
    %148 = vector.extract_strided_slice %0 {offsets = [0, 104], sizes = [8, 8], strides = [1, 1]} : vector<8x112xf32> to vector<8x8xf32>
    %c0_85 = arith.constant 0 : index
    %c0_86 = arith.constant 0 : index
    %149 = vector.load %arg6[%c0_85, %c0_86] : memref<8x30xf32, #tpu.memory_space<vmem>>, vector<8x30xf32>
    %cst_87 = arith.constant dense<0.000000e+00> : vector<8x30xf32>
    %150 = tpu.matmul %148, %149, %cst_87 {dimension_numbers = #tpu.dot_dimension_numbers<[1], [0], [0], [1], [0, 0, 1, 1], [], []>} : vector<8x8xf32>, vector<8x30xf32>, vector<8x30xf32> -> vector<8x30xf32>
    %c0_88 = arith.constant 0 : index
    %c0_89 = arith.constant 0 : index
    %151 = vector.load %arg7[%c0_88, %c0_89] : memref<1x30xf32, #tpu.memory_space<vmem>>, vector<1x30xf32>
    %152 = vector.broadcast %151 : vector<1x30xf32> to vector<8x30xf32>
    %153 = arith.addf %150, %152 : vector<8x30xf32>
    %cst_90 = arith.constant 0.000000e+00 : f32
    %154 = vector.broadcast %cst_90 : f32 to vector<8x30xf32>
    %155 = arith.cmpf ogt, %153, %154 : vector<8x30xf32>
    %cst_91 = arith.constant 0.000000e+00 : f32
    %156 = vector.broadcast %cst_91 : f32 to vector<8x30xf32>
    %157 = arith.minimumf %153, %156 : vector<8x30xf32>
    %158 = math.exp %157 : vector<8x30xf32>
    %cst_92 = arith.constant 1.000000e+00 : f32
    %159 = vector.broadcast %cst_92 : f32 to vector<8x30xf32>
    %160 = arith.subf %158, %159 : vector<8x30xf32>
    %161 = arith.select %155, %153, %160 : vector<8x30xi1>, vector<8x30xf32>
    %c0_93 = arith.constant 0 : index
    %c0_94 = arith.constant 0 : index
    %162 = vector.load %arg9[%c0_93, %c0_94] : memref<1x20xf32, #tpu.memory_space<vmem>>, vector<1x20xf32>
    %c0_95 = arith.constant 0 : index
    %c0_96 = arith.constant 0 : index
    %c0_97 = arith.constant 0 : index
    %163 = vector.load %arg8[%c0_95, %c0_96, %c0_97] : memref<4x30x20xf32, #tpu.memory_space<vmem>>, vector<1x30x20xf32>
    %164 = vector.shape_cast %163 : vector<1x30x20xf32> to vector<30x20xf32>
    %cst_98 = arith.constant dense<0.000000e+00> : vector<8x20xf32>
    %165 = tpu.matmul %35, %164, %cst_98 {dimension_numbers = #tpu.dot_dimension_numbers<[1], [0], [0], [1], [0, 0, 1, 1], [], []>} : vector<8x30xf32>, vector<30x20xf32>, vector<8x20xf32> -> vector<8x20xf32>
    %166 = vector.broadcast %162 : vector<1x20xf32> to vector<8x20xf32>
    %167 = arith.addf %166, %165 : vector<8x20xf32>
    %c1 = arith.constant 1 : index
    %c0_99 = arith.constant 0 : index
    %c0_100 = arith.constant 0 : index
    %168 = vector.load %arg8[%c1, %c0_99, %c0_100] : memref<4x30x20xf32, #tpu.memory_space<vmem>>, vector<1x30x20xf32>
    %169 = vector.shape_cast %168 : vector<1x30x20xf32> to vector<30x20xf32>
    %cst_101 = arith.constant dense<0.000000e+00> : vector<8x20xf32>
    %170 = tpu.matmul %49, %169, %cst_101 {dimension_numbers = #tpu.dot_dimension_numbers<[1], [0], [0], [1], [0, 0, 1, 1], [], []>} : vector<8x30xf32>, vector<30x20xf32>, vector<8x20xf32> -> vector<8x20xf32>
    %171 = arith.addf %167, %170 : vector<8x20xf32>
    %c2 = arith.constant 2 : index
    %c0_102 = arith.constant 0 : index
    %c0_103 = arith.constant 0 : index
    %172 = vector.load %arg8[%c2, %c0_102, %c0_103] : memref<4x30x20xf32, #tpu.memory_space<vmem>>, vector<1x30x20xf32>
    %173 = vector.shape_cast %172 : vector<1x30x20xf32> to vector<30x20xf32>
    %cst_104 = arith.constant dense<0.000000e+00> : vector<8x20xf32>
    %174 = tpu.matmul %63, %173, %cst_104 {dimension_numbers = #tpu.dot_dimension_numbers<[1], [0], [0], [1], [0, 0, 1, 1], [], []>} : vector<8x30xf32>, vector<30x20xf32>, vector<8x20xf32> -> vector<8x20xf32>
    %175 = arith.addf %171, %174 : vector<8x20xf32>
    %c3 = arith.constant 3 : index
    %c0_105 = arith.constant 0 : index
    %c0_106 = arith.constant 0 : index
    %176 = vector.load %arg8[%c3, %c0_105, %c0_106] : memref<4x30x20xf32, #tpu.memory_space<vmem>>, vector<1x30x20xf32>
    %177 = vector.shape_cast %176 : vector<1x30x20xf32> to vector<30x20xf32>
    %cst_107 = arith.constant dense<0.000000e+00> : vector<8x20xf32>
    %178 = tpu.matmul %77, %177, %cst_107 {dimension_numbers = #tpu.dot_dimension_numbers<[1], [0], [0], [1], [0, 0, 1, 1], [], []>} : vector<8x30xf32>, vector<30x20xf32>, vector<8x20xf32> -> vector<8x20xf32>
    %179 = arith.addf %175, %178 : vector<8x20xf32>
    %cst_108 = arith.constant 0.000000e+00 : f32
    %180 = vector.broadcast %cst_108 : f32 to vector<8x20xf32>
    %181 = arith.cmpf ogt, %179, %180 : vector<8x20xf32>
    %cst_109 = arith.constant 0.000000e+00 : f32
    %182 = vector.broadcast %cst_109 : f32 to vector<8x20xf32>
    %183 = arith.minimumf %179, %182 : vector<8x20xf32>
    %184 = math.exp %183 : vector<8x20xf32>
    %cst_110 = arith.constant 1.000000e+00 : f32
    %185 = vector.broadcast %cst_110 : f32 to vector<8x20xf32>
    %186 = arith.subf %184, %185 : vector<8x20xf32>
    %187 = arith.select %181, %179, %186 : vector<8x20xi1>, vector<8x20xf32>
    %c0_111 = arith.constant 0 : index
    %c0_112 = arith.constant 0 : index
    %188 = vector.load %arg9[%c0_111, %c0_112] : memref<1x20xf32, #tpu.memory_space<vmem>>, vector<1x20xf32>
    %c0_113 = arith.constant 0 : index
    %c0_114 = arith.constant 0 : index
    %c0_115 = arith.constant 0 : index
    %189 = vector.load %arg8[%c0_113, %c0_114, %c0_115] : memref<4x30x20xf32, #tpu.memory_space<vmem>>, vector<1x30x20xf32>
    %190 = vector.shape_cast %189 : vector<1x30x20xf32> to vector<30x20xf32>
    %cst_116 = arith.constant dense<0.000000e+00> : vector<8x20xf32>
    %191 = tpu.matmul %63, %190, %cst_116 {dimension_numbers = #tpu.dot_dimension_numbers<[1], [0], [0], [1], [0, 0, 1, 1], [], []>} : vector<8x30xf32>, vector<30x20xf32>, vector<8x20xf32> -> vector<8x20xf32>
    %192 = vector.broadcast %188 : vector<1x20xf32> to vector<8x20xf32>
    %193 = arith.addf %192, %191 : vector<8x20xf32>
    %c1_117 = arith.constant 1 : index
    %c0_118 = arith.constant 0 : index
    %c0_119 = arith.constant 0 : index
    %194 = vector.load %arg8[%c1_117, %c0_118, %c0_119] : memref<4x30x20xf32, #tpu.memory_space<vmem>>, vector<1x30x20xf32>
    %195 = vector.shape_cast %194 : vector<1x30x20xf32> to vector<30x20xf32>
    %cst_120 = arith.constant dense<0.000000e+00> : vector<8x20xf32>
    %196 = tpu.matmul %77, %195, %cst_120 {dimension_numbers = #tpu.dot_dimension_numbers<[1], [0], [0], [1], [0, 0, 1, 1], [], []>} : vector<8x30xf32>, vector<30x20xf32>, vector<8x20xf32> -> vector<8x20xf32>
    %197 = arith.addf %193, %196 : vector<8x20xf32>
    %c2_121 = arith.constant 2 : index
    %c0_122 = arith.constant 0 : index
    %c0_123 = arith.constant 0 : index
    %198 = vector.load %arg8[%c2_121, %c0_122, %c0_123] : memref<4x30x20xf32, #tpu.memory_space<vmem>>, vector<1x30x20xf32>
    %199 = vector.shape_cast %198 : vector<1x30x20xf32> to vector<30x20xf32>
    %cst_124 = arith.constant dense<0.000000e+00> : vector<8x20xf32>
    %200 = tpu.matmul %91, %199, %cst_124 {dimension_numbers = #tpu.dot_dimension_numbers<[1], [0], [0], [1], [0, 0, 1, 1], [], []>} : vector<8x30xf32>, vector<30x20xf32>, vector<8x20xf32> -> vector<8x20xf32>
    %201 = arith.addf %197, %200 : vector<8x20xf32>
    %c3_125 = arith.constant 3 : index
    %c0_126 = arith.constant 0 : index
    %c0_127 = arith.constant 0 : index
    %202 = vector.load %arg8[%c3_125, %c0_126, %c0_127] : memref<4x30x20xf32, #tpu.memory_space<vmem>>, vector<1x30x20xf32>
    %203 = vector.shape_cast %202 : vector<1x30x20xf32> to vector<30x20xf32>
    %cst_128 = arith.constant dense<0.000000e+00> : vector<8x20xf32>
    %204 = tpu.matmul %105, %203, %cst_128 {dimension_numbers = #tpu.dot_dimension_numbers<[1], [0], [0], [1], [0, 0, 1, 1], [], []>} : vector<8x30xf32>, vector<30x20xf32>, vector<8x20xf32> -> vector<8x20xf32>
    %205 = arith.addf %201, %204 : vector<8x20xf32>
    %cst_129 = arith.constant 0.000000e+00 : f32
    %206 = vector.broadcast %cst_129 : f32 to vector<8x20xf32>
    %207 = arith.cmpf ogt, %205, %206 : vector<8x20xf32>
    %cst_130 = arith.constant 0.000000e+00 : f32
    %208 = vector.broadcast %cst_130 : f32 to vector<8x20xf32>
    %209 = arith.minimumf %205, %208 : vector<8x20xf32>
    %210 = math.exp %209 : vector<8x20xf32>
    %cst_131 = arith.constant 1.000000e+00 : f32
    %211 = vector.broadcast %cst_131 : f32 to vector<8x20xf32>
    %212 = arith.subf %210, %211 : vector<8x20xf32>
    %213 = arith.select %207, %205, %212 : vector<8x20xi1>, vector<8x20xf32>
    %c0_132 = arith.constant 0 : index
    %c0_133 = arith.constant 0 : index
    %214 = vector.load %arg9[%c0_132, %c0_133] : memref<1x20xf32, #tpu.memory_space<vmem>>, vector<1x20xf32>
    %c0_134 = arith.constant 0 : index
    %c0_135 = arith.constant 0 : index
    %c0_136 = arith.constant 0 : index
    %215 = vector.load %arg8[%c0_134, %c0_135, %c0_136] : memref<4x30x20xf32, #tpu.memory_space<vmem>>, vector<1x30x20xf32>
    %216 = vector.shape_cast %215 : vector<1x30x20xf32> to vector<30x20xf32>
    %cst_137 = arith.constant dense<0.000000e+00> : vector<8x20xf32>
    %217 = tpu.matmul %91, %216, %cst_137 {dimension_numbers = #tpu.dot_dimension_numbers<[1], [0], [0], [1], [0, 0, 1, 1], [], []>} : vector<8x30xf32>, vector<30x20xf32>, vector<8x20xf32> -> vector<8x20xf32>
    %218 = vector.broadcast %214 : vector<1x20xf32> to vector<8x20xf32>
    %219 = arith.addf %218, %217 : vector<8x20xf32>
    %c1_138 = arith.constant 1 : index
    %c0_139 = arith.constant 0 : index
    %c0_140 = arith.constant 0 : index
    %220 = vector.load %arg8[%c1_138, %c0_139, %c0_140] : memref<4x30x20xf32, #tpu.memory_space<vmem>>, vector<1x30x20xf32>
    %221 = vector.shape_cast %220 : vector<1x30x20xf32> to vector<30x20xf32>
    %cst_141 = arith.constant dense<0.000000e+00> : vector<8x20xf32>
    %222 = tpu.matmul %105, %221, %cst_141 {dimension_numbers = #tpu.dot_dimension_numbers<[1], [0], [0], [1], [0, 0, 1, 1], [], []>} : vector<8x30xf32>, vector<30x20xf32>, vector<8x20xf32> -> vector<8x20xf32>
    %223 = arith.addf %219, %222 : vector<8x20xf32>
    %c2_142 = arith.constant 2 : index
    %c0_143 = arith.constant 0 : index
    %c0_144 = arith.constant 0 : index
    %224 = vector.load %arg8[%c2_142, %c0_143, %c0_144] : memref<4x30x20xf32, #tpu.memory_space<vmem>>, vector<1x30x20xf32>
    %225 = vector.shape_cast %224 : vector<1x30x20xf32> to vector<30x20xf32>
    %cst_145 = arith.constant dense<0.000000e+00> : vector<8x20xf32>
    %226 = tpu.matmul %119, %225, %cst_145 {dimension_numbers = #tpu.dot_dimension_numbers<[1], [0], [0], [1], [0, 0, 1, 1], [], []>} : vector<8x30xf32>, vector<30x20xf32>, vector<8x20xf32> -> vector<8x20xf32>
    %227 = arith.addf %223, %226 : vector<8x20xf32>
    %c3_146 = arith.constant 3 : index
    %c0_147 = arith.constant 0 : index
    %c0_148 = arith.constant 0 : index
    %228 = vector.load %arg8[%c3_146, %c0_147, %c0_148] : memref<4x30x20xf32, #tpu.memory_space<vmem>>, vector<1x30x20xf32>
    %229 = vector.shape_cast %228 : vector<1x30x20xf32> to vector<30x20xf32>
    %cst_149 = arith.constant dense<0.000000e+00> : vector<8x20xf32>
    %230 = tpu.matmul %133, %229, %cst_149 {dimension_numbers = #tpu.dot_dimension_numbers<[1], [0], [0], [1], [0, 0, 1, 1], [], []>} : vector<8x30xf32>, vector<30x20xf32>, vector<8x20xf32> -> vector<8x20xf32>
    %231 = arith.addf %227, %230 : vector<8x20xf32>
    %cst_150 = arith.constant 0.000000e+00 : f32
    %232 = vector.broadcast %cst_150 : f32 to vector<8x20xf32>
    %233 = arith.cmpf ogt, %231, %232 : vector<8x20xf32>
    %cst_151 = arith.constant 0.000000e+00 : f32
    %234 = vector.broadcast %cst_151 : f32 to vector<8x20xf32>
    %235 = arith.minimumf %231, %234 : vector<8x20xf32>
    %236 = math.exp %235 : vector<8x20xf32>
    %cst_152 = arith.constant 1.000000e+00 : f32
    %237 = vector.broadcast %cst_152 : f32 to vector<8x20xf32>
    %238 = arith.subf %236, %237 : vector<8x20xf32>
    %239 = arith.select %233, %231, %238 : vector<8x20xi1>, vector<8x20xf32>
    %c0_153 = arith.constant 0 : index
    %c0_154 = arith.constant 0 : index
    %240 = vector.load %arg9[%c0_153, %c0_154] : memref<1x20xf32, #tpu.memory_space<vmem>>, vector<1x20xf32>
    %c0_155 = arith.constant 0 : index
    %c0_156 = arith.constant 0 : index
    %c0_157 = arith.constant 0 : index
    %241 = vector.load %arg8[%c0_155, %c0_156, %c0_157] : memref<4x30x20xf32, #tpu.memory_space<vmem>>, vector<1x30x20xf32>
    %242 = vector.shape_cast %241 : vector<1x30x20xf32> to vector<30x20xf32>
    %cst_158 = arith.constant dense<0.000000e+00> : vector<8x20xf32>
    %243 = tpu.matmul %119, %242, %cst_158 {dimension_numbers = #tpu.dot_dimension_numbers<[1], [0], [0], [1], [0, 0, 1, 1], [], []>} : vector<8x30xf32>, vector<30x20xf32>, vector<8x20xf32> -> vector<8x20xf32>
    %244 = vector.broadcast %240 : vector<1x20xf32> to vector<8x20xf32>
    %245 = arith.addf %244, %243 : vector<8x20xf32>
    %c1_159 = arith.constant 1 : index
    %c0_160 = arith.constant 0 : index
    %c0_161 = arith.constant 0 : index
    %246 = vector.load %arg8[%c1_159, %c0_160, %c0_161] : memref<4x30x20xf32, #tpu.memory_space<vmem>>, vector<1x30x20xf32>
    %247 = vector.shape_cast %246 : vector<1x30x20xf32> to vector<30x20xf32>
    %cst_162 = arith.constant dense<0.000000e+00> : vector<8x20xf32>
    %248 = tpu.matmul %133, %247, %cst_162 {dimension_numbers = #tpu.dot_dimension_numbers<[1], [0], [0], [1], [0, 0, 1, 1], [], []>} : vector<8x30xf32>, vector<30x20xf32>, vector<8x20xf32> -> vector<8x20xf32>
    %249 = arith.addf %245, %248 : vector<8x20xf32>
    %c2_163 = arith.constant 2 : index
    %c0_164 = arith.constant 0 : index
    %c0_165 = arith.constant 0 : index
    %250 = vector.load %arg8[%c2_163, %c0_164, %c0_165] : memref<4x30x20xf32, #tpu.memory_space<vmem>>, vector<1x30x20xf32>
    %251 = vector.shape_cast %250 : vector<1x30x20xf32> to vector<30x20xf32>
    %cst_166 = arith.constant dense<0.000000e+00> : vector<8x20xf32>
    %252 = tpu.matmul %147, %251, %cst_166 {dimension_numbers = #tpu.dot_dimension_numbers<[1], [0], [0], [1], [0, 0, 1, 1], [], []>} : vector<8x30xf32>, vector<30x20xf32>, vector<8x20xf32> -> vector<8x20xf32>
    %253 = arith.addf %249, %252 : vector<8x20xf32>
    %c3_167 = arith.constant 3 : index
    %c0_168 = arith.constant 0 : index
    %c0_169 = arith.constant 0 : index
    %254 = vector.load %arg8[%c3_167, %c0_168, %c0_169] : memref<4x30x20xf32, #tpu.memory_space<vmem>>, vector<1x30x20xf32>
    %255 = vector.shape_cast %254 : vector<1x30x20xf32> to vector<30x20xf32>
    %cst_170 = arith.constant dense<0.000000e+00> : vector<8x20xf32>
    %256 = tpu.matmul %161, %255, %cst_170 {dimension_numbers = #tpu.dot_dimension_numbers<[1], [0], [0], [1], [0, 0, 1, 1], [], []>} : vector<8x30xf32>, vector<30x20xf32>, vector<8x20xf32> -> vector<8x20xf32>
    %257 = arith.addf %253, %256 : vector<8x20xf32>
    %cst_171 = arith.constant 0.000000e+00 : f32
    %258 = vector.broadcast %cst_171 : f32 to vector<8x20xf32>
    %259 = arith.cmpf ogt, %257, %258 : vector<8x20xf32>
    %cst_172 = arith.constant 0.000000e+00 : f32
    %260 = vector.broadcast %cst_172 : f32 to vector<8x20xf32>
    %261 = arith.minimumf %257, %260 : vector<8x20xf32>
    %262 = math.exp %261 : vector<8x20xf32>
    %cst_173 = arith.constant 1.000000e+00 : f32
    %263 = vector.broadcast %cst_173 : f32 to vector<8x20xf32>
    %264 = arith.subf %262, %263 : vector<8x20xf32>
    %265 = arith.select %259, %257, %264 : vector<8x20xi1>, vector<8x20xf32>
    %c0_174 = arith.constant 0 : index
    %c0_175 = arith.constant 0 : index
    %266 = vector.load %arg11[%c0_174, %c0_175] : memref<1x10xf32, #tpu.memory_space<vmem>>, vector<1x10xf32>
    %c0_176 = arith.constant 0 : index
    %c0_177 = arith.constant 0 : index
    %c0_178 = arith.constant 0 : index
    %267 = vector.load %arg10[%c0_176, %c0_177, %c0_178] : memref<2x20x10xf32, #tpu.memory_space<vmem>>, vector<1x20x10xf32>
    %268 = vector.shape_cast %267 : vector<1x20x10xf32> to vector<20x10xf32>
    %cst_179 = arith.constant dense<0.000000e+00> : vector<8x10xf32>
    %269 = tpu.matmul %187, %268, %cst_179 {dimension_numbers = #tpu.dot_dimension_numbers<[1], [0], [0], [1], [0, 0, 1, 1], [], []>} : vector<8x20xf32>, vector<20x10xf32>, vector<8x10xf32> -> vector<8x10xf32>
    %270 = vector.broadcast %266 : vector<1x10xf32> to vector<8x10xf32>
    %271 = arith.addf %270, %269 : vector<8x10xf32>
    %c1_180 = arith.constant 1 : index
    %c0_181 = arith.constant 0 : index
    %c0_182 = arith.constant 0 : index
    %272 = vector.load %arg10[%c1_180, %c0_181, %c0_182] : memref<2x20x10xf32, #tpu.memory_space<vmem>>, vector<1x20x10xf32>
    %273 = vector.shape_cast %272 : vector<1x20x10xf32> to vector<20x10xf32>
    %cst_183 = arith.constant dense<0.000000e+00> : vector<8x10xf32>
    %274 = tpu.matmul %213, %273, %cst_183 {dimension_numbers = #tpu.dot_dimension_numbers<[1], [0], [0], [1], [0, 0, 1, 1], [], []>} : vector<8x20xf32>, vector<20x10xf32>, vector<8x10xf32> -> vector<8x10xf32>
    %275 = arith.addf %271, %274 : vector<8x10xf32>
    %cst_184 = arith.constant 0.000000e+00 : f32
    %276 = vector.broadcast %cst_184 : f32 to vector<8x10xf32>
    %277 = arith.cmpf ogt, %275, %276 : vector<8x10xf32>
    %cst_185 = arith.constant 0.000000e+00 : f32
    %278 = vector.broadcast %cst_185 : f32 to vector<8x10xf32>
    %279 = arith.minimumf %275, %278 : vector<8x10xf32>
    %280 = math.exp %279 : vector<8x10xf32>
    %cst_186 = arith.constant 1.000000e+00 : f32
    %281 = vector.broadcast %cst_186 : f32 to vector<8x10xf32>
    %282 = arith.subf %280, %281 : vector<8x10xf32>
    %283 = arith.select %277, %275, %282 : vector<8x10xi1>, vector<8x10xf32>
    %c0_187 = arith.constant 0 : index
    %c0_188 = arith.constant 0 : index
    %284 = vector.load %arg11[%c0_187, %c0_188] : memref<1x10xf32, #tpu.memory_space<vmem>>, vector<1x10xf32>
    %c0_189 = arith.constant 0 : index
    %c0_190 = arith.constant 0 : index
    %c0_191 = arith.constant 0 : index
    %285 = vector.load %arg10[%c0_189, %c0_190, %c0_191] : memref<2x20x10xf32, #tpu.memory_space<vmem>>, vector<1x20x10xf32>
    %286 = vector.shape_cast %285 : vector<1x20x10xf32> to vector<20x10xf32>
    %cst_192 = arith.constant dense<0.000000e+00> : vector<8x10xf32>
    %287 = tpu.matmul %213, %286, %cst_192 {dimension_numbers = #tpu.dot_dimension_numbers<[1], [0], [0], [1], [0, 0, 1, 1], [], []>} : vector<8x20xf32>, vector<20x10xf32>, vector<8x10xf32> -> vector<8x10xf32>
    %288 = vector.broadcast %284 : vector<1x10xf32> to vector<8x10xf32>
    %289 = arith.addf %288, %287 : vector<8x10xf32>
    %c1_193 = arith.constant 1 : index
    %c0_194 = arith.constant 0 : index
    %c0_195 = arith.constant 0 : index
    %290 = vector.load %arg10[%c1_193, %c0_194, %c0_195] : memref<2x20x10xf32, #tpu.memory_space<vmem>>, vector<1x20x10xf32>
    %291 = vector.shape_cast %290 : vector<1x20x10xf32> to vector<20x10xf32>
    %cst_196 = arith.constant dense<0.000000e+00> : vector<8x10xf32>
    %292 = tpu.matmul %239, %291, %cst_196 {dimension_numbers = #tpu.dot_dimension_numbers<[1], [0], [0], [1], [0, 0, 1, 1], [], []>} : vector<8x20xf32>, vector<20x10xf32>, vector<8x10xf32> -> vector<8x10xf32>
    %293 = arith.addf %289, %292 : vector<8x10xf32>
    %cst_197 = arith.constant 0.000000e+00 : f32
    %294 = vector.broadcast %cst_197 : f32 to vector<8x10xf32>
    %295 = arith.cmpf ogt, %293, %294 : vector<8x10xf32>
    %cst_198 = arith.constant 0.000000e+00 : f32
    %296 = vector.broadcast %cst_198 : f32 to vector<8x10xf32>
    %297 = arith.minimumf %293, %296 : vector<8x10xf32>
    %298 = math.exp %297 : vector<8x10xf32>
    %cst_199 = arith.constant 1.000000e+00 : f32
    %299 = vector.broadcast %cst_199 : f32 to vector<8x10xf32>
    %300 = arith.subf %298, %299 : vector<8x10xf32>
    %301 = arith.select %295, %293, %300 : vector<8x10xi1>, vector<8x10xf32>
    %c0_200 = arith.constant 0 : index
    %c0_201 = arith.constant 0 : index
    %302 = vector.load %arg11[%c0_200, %c0_201] : memref<1x10xf32, #tpu.memory_space<vmem>>, vector<1x10xf32>
    %c0_202 = arith.constant 0 : index
    %c0_203 = arith.constant 0 : index
    %c0_204 = arith.constant 0 : index
    %303 = vector.load %arg10[%c0_202, %c0_203, %c0_204] : memref<2x20x10xf32, #tpu.memory_space<vmem>>, vector<1x20x10xf32>
    %304 = vector.shape_cast %303 : vector<1x20x10xf32> to vector<20x10xf32>
    %cst_205 = arith.constant dense<0.000000e+00> : vector<8x10xf32>
    %305 = tpu.matmul %239, %304, %cst_205 {dimension_numbers = #tpu.dot_dimension_numbers<[1], [0], [0], [1], [0, 0, 1, 1], [], []>} : vector<8x20xf32>, vector<20x10xf32>, vector<8x10xf32> -> vector<8x10xf32>
    %306 = vector.broadcast %302 : vector<1x10xf32> to vector<8x10xf32>
    %307 = arith.addf %306, %305 : vector<8x10xf32>
    %c1_206 = arith.constant 1 : index
    %c0_207 = arith.constant 0 : index
    %c0_208 = arith.constant 0 : index
    %308 = vector.load %arg10[%c1_206, %c0_207, %c0_208] : memref<2x20x10xf32, #tpu.memory_space<vmem>>, vector<1x20x10xf32>
    %309 = vector.shape_cast %308 : vector<1x20x10xf32> to vector<20x10xf32>
    %cst_209 = arith.constant dense<0.000000e+00> : vector<8x10xf32>
    %310 = tpu.matmul %265, %309, %cst_209 {dimension_numbers = #tpu.dot_dimension_numbers<[1], [0], [0], [1], [0, 0, 1, 1], [], []>} : vector<8x20xf32>, vector<20x10xf32>, vector<8x10xf32> -> vector<8x10xf32>
    %311 = arith.addf %307, %310 : vector<8x10xf32>
    %cst_210 = arith.constant 0.000000e+00 : f32
    %312 = vector.broadcast %cst_210 : f32 to vector<8x10xf32>
    %313 = arith.cmpf ogt, %311, %312 : vector<8x10xf32>
    %cst_211 = arith.constant 0.000000e+00 : f32
    %314 = vector.broadcast %cst_211 : f32 to vector<8x10xf32>
    %315 = arith.minimumf %311, %314 : vector<8x10xf32>
    %316 = math.exp %315 : vector<8x10xf32>
    %cst_212 = arith.constant 1.000000e+00 : f32
    %317 = vector.broadcast %cst_212 : f32 to vector<8x10xf32>
    %318 = arith.subf %316, %317 : vector<8x10xf32>
    %319 = arith.select %313, %311, %318 : vector<8x10xi1>, vector<8x10xf32>
    %c0_213 = arith.constant 0 : index
    %c0_214 = arith.constant 0 : index
    %320 = vector.load %arg13[%c0_213, %c0_214] : memref<1x16xf32, #tpu.memory_space<vmem>>, vector<1x16xf32>
    %c0_215 = arith.constant 0 : index
    %c0_216 = arith.constant 0 : index
    %c0_217 = arith.constant 0 : index
    %321 = vector.load %arg12[%c0_215, %c0_216, %c0_217] : memref<3x10x16xf32, #tpu.memory_space<vmem>>, vector<1x10x16xf32>
    %322 = vector.shape_cast %321 : vector<1x10x16xf32> to vector<10x16xf32>
    %cst_218 = arith.constant dense<0.000000e+00> : vector<8x16xf32>
    %323 = tpu.matmul %283, %322, %cst_218 {dimension_numbers = #tpu.dot_dimension_numbers<[1], [0], [0], [1], [0, 0, 1, 1], [], []>} : vector<8x10xf32>, vector<10x16xf32>, vector<8x16xf32> -> vector<8x16xf32>
    %324 = vector.broadcast %320 : vector<1x16xf32> to vector<8x16xf32>
    %325 = arith.addf %324, %323 : vector<8x16xf32>
    %c1_219 = arith.constant 1 : index
    %c0_220 = arith.constant 0 : index
    %c0_221 = arith.constant 0 : index
    %326 = vector.load %arg12[%c1_219, %c0_220, %c0_221] : memref<3x10x16xf32, #tpu.memory_space<vmem>>, vector<1x10x16xf32>
    %327 = vector.shape_cast %326 : vector<1x10x16xf32> to vector<10x16xf32>
    %cst_222 = arith.constant dense<0.000000e+00> : vector<8x16xf32>
    %328 = tpu.matmul %301, %327, %cst_222 {dimension_numbers = #tpu.dot_dimension_numbers<[1], [0], [0], [1], [0, 0, 1, 1], [], []>} : vector<8x10xf32>, vector<10x16xf32>, vector<8x16xf32> -> vector<8x16xf32>
    %329 = arith.addf %325, %328 : vector<8x16xf32>
    %c2_223 = arith.constant 2 : index
    %c0_224 = arith.constant 0 : index
    %c0_225 = arith.constant 0 : index
    %330 = vector.load %arg12[%c2_223, %c0_224, %c0_225] : memref<3x10x16xf32, #tpu.memory_space<vmem>>, vector<1x10x16xf32>
    %331 = vector.shape_cast %330 : vector<1x10x16xf32> to vector<10x16xf32>
    %cst_226 = arith.constant dense<0.000000e+00> : vector<8x16xf32>
    %332 = tpu.matmul %319, %331, %cst_226 {dimension_numbers = #tpu.dot_dimension_numbers<[1], [0], [0], [1], [0, 0, 1, 1], [], []>} : vector<8x10xf32>, vector<10x16xf32>, vector<8x16xf32> -> vector<8x16xf32>
    %333 = arith.addf %329, %332 : vector<8x16xf32>
    %cst_227 = arith.constant 0.000000e+00 : f32
    %334 = vector.broadcast %cst_227 : f32 to vector<8x16xf32>
    %335 = arith.cmpf ogt, %333, %334 : vector<8x16xf32>
    %cst_228 = arith.constant 0.000000e+00 : f32
    %336 = vector.broadcast %cst_228 : f32 to vector<8x16xf32>
    %337 = arith.minimumf %333, %336 : vector<8x16xf32>
    %338 = math.exp %337 : vector<8x16xf32>
    %cst_229 = arith.constant 1.000000e+00 : f32
    %339 = vector.broadcast %cst_229 : f32 to vector<8x16xf32>
    %340 = arith.subf %338, %339 : vector<8x16xf32>
    %341 = arith.select %335, %333, %340 : vector<8x16xi1>, vector<8x16xf32>
    %c0_230 = arith.constant 0 : index
    %c0_231 = arith.constant 0 : index
    %342 = vector.load %arg14[%c0_230, %c0_231] : memref<8x64xf32, #tpu.memory_space<vmem>>, vector<8x64xf32>
    %cst_232 = arith.constant dense<0.000000e+00> : vector<8x64xf32>
    %343 = tpu.matmul %1, %342, %cst_232 {dimension_numbers = #tpu.dot_dimension_numbers<[1], [0], [0], [1], [0, 0, 1, 1], [], []>} : vector<8x8xf32>, vector<8x64xf32>, vector<8x64xf32> -> vector<8x64xf32>
    %c0_233 = arith.constant 0 : index
    %c0_234 = arith.constant 0 : index
    %344 = vector.load %arg15[%c0_233, %c0_234] : memref<16x64xf32, #tpu.memory_space<vmem>>, vector<16x64xf32>
    %cst_235 = arith.constant dense<0.000000e+00> : vector<8x64xf32>
    %345 = tpu.matmul %21, %344, %cst_235 {dimension_numbers = #tpu.dot_dimension_numbers<[1], [0], [0], [1], [0, 0, 1, 1], [], []>} : vector<8x16xf32>, vector<16x64xf32>, vector<8x64xf32> -> vector<8x64xf32>
    %346 = arith.addf %343, %345 : vector<8x64xf32>
    %c0_236 = arith.constant 0 : index
    %c0_237 = arith.constant 0 : index
    %347 = vector.load %arg16[%c0_236, %c0_237] : memref<16x64xf32, #tpu.memory_space<vmem>>, vector<16x64xf32>
    %cst_238 = arith.constant dense<0.000000e+00> : vector<8x64xf32>
    %348 = tpu.matmul %341, %347, %cst_238 {dimension_numbers = #tpu.dot_dimension_numbers<[1], [0], [0], [1], [0, 0, 1, 1], [], []>} : vector<8x16xf32>, vector<16x64xf32>, vector<8x64xf32> -> vector<8x64xf32>
    %349 = arith.addf %346, %348 : vector<8x64xf32>
    %c0_239 = arith.constant 0 : index
    %c0_240 = arith.constant 0 : index
    %350 = vector.load %arg17[%c0_239, %c0_240] : memref<1x64xf32, #tpu.memory_space<vmem>>, vector<1x64xf32>
    %351 = vector.broadcast %350 : vector<1x64xf32> to vector<8x64xf32>
    %352 = arith.addf %349, %351 : vector<8x64xf32>
    %cst_241 = arith.constant 0.000000e+00 : f32
    %353 = vector.broadcast %cst_241 : f32 to vector<8x64xf32>
    %354 = arith.cmpf ogt, %352, %353 : vector<8x64xf32>
    %cst_242 = arith.constant 0.000000e+00 : f32
    %355 = vector.broadcast %cst_242 : f32 to vector<8x64xf32>
    %356 = arith.minimumf %352, %355 : vector<8x64xf32>
    %357 = math.exp %356 : vector<8x64xf32>
    %cst_243 = arith.constant 1.000000e+00 : f32
    %358 = vector.broadcast %cst_243 : f32 to vector<8x64xf32>
    %359 = arith.subf %357, %358 : vector<8x64xf32>
    %360 = arith.select %354, %352, %359 : vector<8x64xi1>, vector<8x64xf32>
    %c0_244 = arith.constant 0 : index
    %c0_245 = arith.constant 0 : index
    %361 = vector.load %arg18[%c0_244, %c0_245] : memref<64x32xf32, #tpu.memory_space<vmem>>, vector<64x32xf32>
    %cst_246 = arith.constant dense<0.000000e+00> : vector<8x32xf32>
    %362 = tpu.matmul %360, %361, %cst_246 {dimension_numbers = #tpu.dot_dimension_numbers<[1], [0], [0], [1], [0, 0, 1, 1], [], []>} : vector<8x64xf32>, vector<64x32xf32>, vector<8x32xf32> -> vector<8x32xf32>
    %c0_247 = arith.constant 0 : index
    %c0_248 = arith.constant 0 : index
    %363 = vector.load %arg19[%c0_247, %c0_248] : memref<1x32xf32, #tpu.memory_space<vmem>>, vector<1x32xf32>
    %364 = vector.broadcast %363 : vector<1x32xf32> to vector<8x32xf32>
    %365 = arith.addf %362, %364 : vector<8x32xf32>
    %cst_249 = arith.constant 0.000000e+00 : f32
    %366 = vector.broadcast %cst_249 : f32 to vector<8x32xf32>
    %367 = arith.cmpf ogt, %365, %366 : vector<8x32xf32>
    %cst_250 = arith.constant 0.000000e+00 : f32
    %368 = vector.broadcast %cst_250 : f32 to vector<8x32xf32>
    %369 = arith.minimumf %365, %368 : vector<8x32xf32>
    %370 = math.exp %369 : vector<8x32xf32>
    %cst_251 = arith.constant 1.000000e+00 : f32
    %371 = vector.broadcast %cst_251 : f32 to vector<8x32xf32>
    %372 = arith.subf %370, %371 : vector<8x32xf32>
    %373 = arith.select %367, %365, %372 : vector<8x32xi1>, vector<8x32xf32>
    %c0_252 = arith.constant 0 : index
    %c0_253 = arith.constant 0 : index
    %374 = vector.load %arg20[%c0_252, %c0_253] : memref<32x128xf32, #tpu.memory_space<vmem>>, vector<32x128xf32>
    %cst_254 = arith.constant dense<0.000000e+00> : vector<8x128xf32>
    %375 = tpu.matmul %373, %374, %cst_254 {dimension_numbers = #tpu.dot_dimension_numbers<[1], [0], [0], [1], [0, 0, 1, 1], [], []>} : vector<8x32xf32>, vector<32x128xf32>, vector<8x128xf32> -> vector<8x128xf32>
    %c0_255 = arith.constant 0 : index
    %c0_256 = arith.constant 0 : index
    %376 = vector.load %arg21[%c0_255, %c0_256] : memref<1x128xf32, #tpu.memory_space<vmem>>, vector<1x128xf32>
    %377 = vector.broadcast %376 : vector<1x128xf32> to vector<8x128xf32>
    %378 = arith.addf %375, %377 : vector<8x128xf32>
    %c0_257 = arith.constant 0 : index
    %c0_258 = arith.constant 0 : index
    %379 = vector.load %arg22[%c0_257, %c0_258] : memref<8x128xf32, #tpu.memory_space<vmem>>, vector<8x128xf32>
    tpu.vector_store %arg22[%c0_257, %c0_258], %378 {strides = array<i32>} : memref<8x128xf32, #tpu.memory_space<vmem>>, vector<8x128xf32>,
    return
  }
  func.func @transform_0(%arg0: i32) -> (i32, i32) {
    %c0_i32 = arith.constant 0 : i32
    %c0_i32_0 = arith.constant 0 : i32
    return %arg0, %c0_i32 : i32, i32
  }
  func.func @transform_1(%arg0: i32) -> (i32, i32) {
    %c0_i32 = arith.constant 0 : i32
    %c0_i32_0 = arith.constant 0 : i32
    %c0_i32_1 = arith.constant 0 : i32
    return %c0_i32, %c0_i32_0 : i32, i32
  }
  func.func @transform_2(%arg0: i32) -> (i32, i32) {
    %c0_i32 = arith.constant 0 : i32
    %c0_i32_0 = arith.constant 0 : i32
    %c0_i32_1 = arith.constant 0 : i32
    return %c0_i32, %c0_i32_0 : i32, i32
  }
  func.func @transform_3(%arg0: i32) -> (i32, i32) {
    %c0_i32 = arith.constant 0 : i32
    %c0_i32_0 = arith.constant 0 : i32
    %c0_i32_1 = arith.constant 0 : i32
    return %c0_i32, %c0_i32_0 : i32, i32
  }
  func.func @transform_4(%arg0: i32) -> (i32, i32) {
    %c0_i32 = arith.constant 0 : i32
    %c0_i32_0 = arith.constant 0 : i32
    %c0_i32_1 = arith.constant 0 : i32
    return %c0_i32, %c0_i32_0 : i32, i32
  }
  func.func @transform_5(%arg0: i32) -> (i32, i32) {
    %c0_i32 = arith.constant 0 : i32
    %c0_i32_0 = arith.constant 0 : i32
    %c0_i32_1 = arith.constant 0 : i32
    return %c0_i32, %c0_i32_0 : i32, i32
  }
  func.func @transform_6(%arg0: i32) -> (i32, i32) {
    %c0_i32 = arith.constant 0 : i32
    %c0_i32_0 = arith.constant 0 : i32
    %c0_i32_1 = arith.constant 0 : i32
    return %c0_i32, %c0_i32_0 : i32, i32
  }
  func.func @transform_7(%arg0: i32) -> (i32, i32, i32) {
    %c0_i32 = arith.constant 0 : i32
    %c0_i32_0 = arith.constant 0 : i32
    %c0_i32_1 = arith.constant 0 : i32
    %c0_i32_2 = arith.constant 0 : i32
    return %c0_i32, %c0_i32_0, %c0_i32_1 : i32, i32, i32
  }
  func.func @transform_8(%arg0: i32) -> (i32, i32) {
    %c0_i32 = arith.constant 0 : i32
    %c0_i32_0 = arith.constant 0 : i32
    %c0_i32_1 = arith.constant 0 : i32
    return %c0_i32, %c0_i32_0 : i32, i32
  }
  func.func @transform_9(%arg0: i32) -> (i32, i32, i32) {
    %c0_i32 = arith.constant 0 : i32
    %c0_i32_0 = arith.constant 0 : i32
    %c0_i32_1 = arith.constant 0 : i32
    %c0_i32_2 = arith.constant 0 : i32
    return %c0_i32, %c0_i32_0, %c0_i32_1 : i32, i32, i32
  }
  func.func @transform_10(%arg0: i32) -> (i32, i32) {
    %c0_i32 = arith.constant 0 : i32
    %c0_i32_0 = arith.constant 0 : i32
    %c0_i32_1 = arith.constant 0 : i32
    return %c0_i32, %c0_i32_0 : i32, i32
  }
  func.func @transform_11(%arg0: i32) -> (i32, i32, i32) {
    %c0_i32 = arith.constant 0 : i32
    %c0_i32_0 = arith.constant 0 : i32
    %c0_i32_1 = arith.constant 0 : i32
    %c0_i32_2 = arith.constant 0 : i32
    return %c0_i32, %c0_i32_0, %c0_i32_1 : i32, i32, i32
  }
  func.func @transform_12(%arg0: i32) -> (i32, i32) {
    %c0_i32 = arith.constant 0 : i32
    %c0_i32_0 = arith.constant 0 : i32
    %c0_i32_1 = arith.constant 0 : i32
    return %c0_i32, %c0_i32_0 : i32, i32
  }
  func.func @transform_13(%arg0: i32) -> (i32, i32) {
    %c0_i32 = arith.constant 0 : i32
    %c0_i32_0 = arith.constant 0 : i32
    %c0_i32_1 = arith.constant 0 : i32
    return %c0_i32, %c0_i32_0 : i32, i32
  }
  func.func @transform_14(%arg0: i32) -> (i32, i32) {
    %c0_i32 = arith.constant 0 : i32
    %c0_i32_0 = arith.constant 0 : i32
    %c0_i32_1 = arith.constant 0 : i32
    return %c0_i32, %c0_i32_0 : i32, i32
  }
  func.func @transform_15(%arg0: i32) -> (i32, i32) {
    %c0_i32 = arith.constant 0 : i32
    %c0_i32_0 = arith.constant 0 : i32
    %c0_i32_1 = arith.constant 0 : i32
    return %c0_i32, %c0_i32_0 : i32, i32
  }
  func.func @transform_16(%arg0: i32) -> (i32, i32) {
    %c0_i32 = arith.constant 0 : i32
    %c0_i32_0 = arith.constant 0 : i32
    %c0_i32_1 = arith.constant 0 : i32
    return %c0_i32, %c0_i32_0 : i32, i32
  }
  func.func @transform_17(%arg0: i32) -> (i32, i32) {
    %c0_i32 = arith.constant 0 : i32
    %c0_i32_0 = arith.constant 0 : i32
    %c0_i32_1 = arith.constant 0 : i32
    return %c0_i32, %c0_i32_0 : i32, i32
  }
  func.func @transform_18(%arg0: i32) -> (i32, i32) {
    %c0_i32 = arith.constant 0 : i32
    %c0_i32_0 = arith.constant 0 : i32
    %c0_i32_1 = arith.constant 0 : i32
    return %c0_i32, %c0_i32_0 : i32, i32
  }
  func.func @transform_19(%arg0: i32) -> (i32, i32) {
    %c0_i32 = arith.constant 0 : i32
    %c0_i32_0 = arith.constant 0 : i32
    %c0_i32_1 = arith.constant 0 : i32
    return %c0_i32, %c0_i32_0 : i32, i32
  }
  func.func @transform_20(%arg0: i32) -> (i32, i32) {
    %c0_i32 = arith.constant 0 : i32
    %c0_i32_0 = arith.constant 0 : i32
    %c0_i32_1 = arith.constant 0 : i32
    return %c0_i32, %c0_i32_0 : i32, i32
  }
  func.func @transform_21(%arg0: i32) -> (i32, i32) {
    %c0_i32 = arith.constant 0 : i32
    %c0_i32_0 = arith.constant 0 : i32
    return %arg0, %c0_i32 : i32, i32
  }
}

</mosaic_0001>

<bundles_post_ra>
// kernel: actor_forward_pallas.1
= control target key start
LH: loop header
LB: loop body
LE: loop exit
PB: predicated region body
PF: predicated region fallthrough
CT: control target
= control target key end

     0   :  { %v4362_v1 = vmov 0.0|0.0   ;;  %vm4363_vm0 = vmmov 0   ;;  %v4364_v4 = vmov 0.0   ;;  %s4366_s30 = smov 88   ;;  %s4368_s24 = smov 80   ;;  %vm81_vm1 = vcmask 130048   ;;  %s5039_s0 = inlined_call_operand.vmem [shape: f32[8,112], index: 0, kind: input, shape index: {}]   ;;  %s5040_s1 = inlined_call_operand.vmem [shape: f32[16,32], index: 1, kind: input, shape index: {}]   ;;  %s5041_s5 = inlined_call_operand.vmem [shape: f32[8,30], index: 5, kind: input, shape index: {}]   ;;  %s5042_s3 = inlined_call_operand.vmem [shape: f32[32,16], index: 3, kind: input, shape index: {}]   ;;  %s5043_s7 = inlined_call_operand.vmem [shape: f32[4,30,20], index: 7, kind: input, shape index: {}]   ;;  %s5044_s2 = inlined_call_operand.vmem [shape: f32[1,32], index: 2, kind: input, shape index: {}]   ;;  %s5045_s6 = inlined_call_operand.vmem [shape: f32[1,30], index: 6, kind: input, shape index: {}]   ;;  %s5046_s9 = inlined_call_operand.vmem [shape: f32[2,20,10], index: 9, kind: input, shape index: {}]   ;;  %s5047_s8 = inlined_call_operand.vmem [shape: f32[1,20], index: 8, kind: input, shape index: {}]   ;;  %s5048_s4 = inlined_call_operand.vmem [shape: f32[1,16], index: 4, kind: input, shape index: {}]   ;;  %s5049_s14 = inlined_call_operand.vmem [shape: f32[16,64], index: 14, kind: input, shape index: {}]   ;;  %s5050_s11 = inlined_call_operand.vmem [shape: f32[3,10,16], index: 11, kind: input, shape index: {}]   ;;  %s5051_s10 = inlined_call_operand.vmem [shape: f32[1,10], index: 10, kind: input, shape index: {}]   ;;  %s5052_s13 = inlined_call_operand.vmem [shape: f32[8,64], index: 13, kind: input, shape index: {}]   ;;  %s5053_s15 = inlined_call_operand.vmem [shape: f32[16,64], index: 15, kind: input, shape index: {}]   ;;  %s5054_s12 = inlined_call_operand.vmem [shape: f32[1,16], index: 12, kind: input, shape index: {}]   ;;  %s5055_s17 = inlined_call_operand.vmem [shape: f32[64,32], index: 17, kind: input, shape index: {}]   ;;  %s5056_s16 = inlined_call_operand.vmem [shape: f32[1,64], index: 16, kind: input, shape index: {}]   ;;  %s5057_s19 = inlined_call_operand.vmem [shape: f32[32,128], index: 19, kind: input, shape index: {}]   ;;  %s5058_s18 = inlined_call_operand.vmem [shape: f32[1,32], index: 18, kind: input, shape index: {}]   ;;  %s5059_s20 = inlined_call_operand.vmem [shape: f32[1,128], index: 20, kind: input, shape index: {}]   ;;  %s5060_s21 = inlined_call_operand.vmem [shape: f32[8,128], index: 21, kind: output, shape index: {}]  }
   0x1   :  { %5064 = sst [smem:[#allocation2_spill]] %s5039_s0  ;;  %4086 = vmatprep.subr.bf16.mxu1 %v4362_v1  ;;  %3722 = vmatprep.mubr.msk.f32.mxu1 %vm4363_vm0, %v4364_v4  ;;  %s4370_s25 = smov 64   ;;  %vm256_vm2 = vcmask 64512   ;;  %vm1064_vm3 = vcmask 1045504   ;;  %vm4376_vm4 = vmmov 1   ;;  %vm171_vm6 = vcmask 261120  }
   0x2   :  { %5065 = sst [smem:[#allocation3_spill]] %s5040_s1  ;;  %s5070_s26 = sld [smem:[#allocation2_spill]]  ;;  %3736 = vmatprep.subr.mxu0 %v4364_v4  ;;  %3738 = vmatprep.mubr.msk.f32.mxu0 %vm4363_vm0, %v4364_v4  ;;  %vm4587_vm5 = vmpackc.low %vm1064_vm3, %vm4376_vm4  ;;  %v4601_v35 = vld [vmem:[%s5045_s6] ss:$0 sm:$0xff]  ;;  %vm1060_vm9 = vcmask 244736  }
   0x3   :  { %5066 = sst [smem:[#allocation4_spill]] %s5041_s5  ;;  %s5071_s28 = sld [smem:[#allocation3_spill]]  ;;  %v2288_v26 = vld [vmem:[%s5046_s9 + $0x10] sm:$0xf] }
   0x4   :  { %5067 = sst [smem:[#allocation5_spill]] %s5042_s3  ;;  %s5072_s23 = sld [smem:[#allocation4_spill]] }
   0x5   :  { %5068 = sst [smem:[#allocation6_spill]] %s5043_s7  ;;  %s4365_s7 = smov 120  }
   0x6   :  { %5069 = sst [smem:[#allocation7_spill]] %s5044_s2  ;;  %s4367_s1 = smov 96  }
   0x7   :  { %s4369_s5 = smov 72   ;;  %s4372_s27 = smov 48  }
   0x8   :  { %v4490_v0 = vld [vmem:[%s5070_s26] sm:$0xff]  ;;  %s4371_s26 = smov 56   ;;  %s4373_s3 = smov 40  }
   0x9   :  { %v69_v2 = vld [vmem:[%s5071_s28] sm:$0xff]  ;;  %v70_v3 = vld [vmem:[%s5071_s28 + $0x8] sm:$0xff]  ;;  %79 = vrot.lane.b32.xlu0 %v4490_v0, %s4365_s7  ;;  %335 = vrot.lane.b32.xlu1 %v4490_v0, %s4366_s30  ;;  %s4374_s28 = smov 32   ;;  %s4375_s29 = smov 24  }
   0xa   :  { %v4087_v5 = vpack.c.bf16 %v70_v3, %v69_v2  ;;  %v4506_v6 = vld [vmem:[%s5072_s23] sm:$0xff]  ;;  %s5073_s30 = sld [smem:[#allocation5_spill]]  ;;  %s5077_s23 = sld [smem:[#allocation7_spill]] }
   0xb   :  { %3737 = vmatpush3.msra.mxu0 %v4506_v6 }
   0xc   :  { %4088 = vmatpush3.bf16.msra.mxu1 %v4087_v5  ;;  %3741 = vmatprep.subr.mxu0 %v4364_v4 }
   0xd   :  { %4089 = vmatprep.subr.bf16.mxu1 %v4362_v1  ;;  %254 = vrot.lane.b32.xlu0 %v4490_v0, %s4367_s1 }
   0xe   :  { %415 = vrot.lane.b32.xlu1 %v4490_v0, %s4368_s24 }
  0x10   :  { %v160_v10 = vld [vmem:[%s5073_s30] sm:$0xff]  ;;  %v161_v11 = vld [vmem:[%s5073_s30 + $0x8] sm:$0xff]  ;;  %v162_v14 = vld [vmem:[%s5073_s30 + $0x10] sm:$0xff] }
  0x11   :  { %495 = vrot.lane.b32.xlu0 %v4490_v0, %s4369_s5  ;;  %v4090_v12 = vpack.c.bf16 %v161_v11, %v160_v10  ;;  %v163_v15 = vld [vmem:[%s5073_s30 + $0x18] sm:$0xff]  ;;  %v3439_v27 = vld [vmem:[%s5077_s23] ss:$0 sm:$0xff] }
  0x12   :  { %575 = vrot.lane.b32.xlu1 %v4490_v0, %s4370_s25  ;;  %v4093_v16 = vpack.c.bf16 %v163_v15, %v162_v14 }
  0x15   :  { %655 = vrot.lane.b32.xlu0 %v4490_v0, %s4371_s26 }
  0x16   :  { %735 = vrot.lane.b32.xlu1 %v4490_v0, %s4372_s27  ;;  %s5074_s27 = sld [smem:[#allocation6_spill]] }
  0x19   :  { %815 = vrot.lane.b32.xlu0 %v4490_v0, %s4373_s3 }
  0x1a   :  { %895 = vrot.lane.b32.xlu1 %v4490_v0, %s4374_s28 }
  0x1c   :  { %v1056_v20 = vld [vmem:[%s5074_s27] sm:$0xff]  ;;  %v1057_v21 = vld [vmem:[%s5074_s27 + $0x8] sm:$0xff]  ;;  %v1058_v23 = vld [vmem:[%s5074_s27 + $0x10] sm:$0xff] }
  0x1d   :  { %975 = vrot.lane.b32.xlu0 %v4490_v0, %s4375_s29  ;;  %v4574_v22 = vpack.c.bf16 %v1057_v21, %v1056_v20  ;;  %v1059_v24 = vld [vmem:[%s5074_s27 + $0x18] sm:$0x3f]  ;;  %v3468_v48 = vld [vmem:[%s5074_s27 + $0x20] sm:$0xff]  ;;  %v3469_v49 = vld [vmem:[%s5074_s27 + $0x28] sm:$0xff] }
  0x1e   :  { %v4584_v25 = vpack.c.bf16 %v1059_v24, %v1058_v23  ;;  %v4638_v51 = vpack.c.bf16 %v3469_v49, %v3468_v48  ;;  %v3470_v59 = vld [vmem:[%s5074_s27 + $0x30] sm:$0xff]  ;;  %v3471_v60 = vld [vmem:[%s5074_s27 + $0x38] sm:$0x3f] }
  0x1f   :  { %v4653_v61 = vpack.c.bf16 %v3471_v60, %v3470_v59  ;;  %v3477_v10 = vld [vmem:[%s5074_s27 + $0x58] sm:$0x3f] }
  0x7b   :  { %v80_v7 = vpop.permute.xlu0 %79  ;;  %v336_v9 = vpop.permute.xlu1 %335 }
  0x7c   :  { %3723 = vmatmul.mubr.msk.f32.vlgmr.msra.gmra.mrb[0].mxu1 %vm81_vm1, %v80_v7  ;;  %v3475_v7 = vld [vmem:[%s5074_s27 + $0x48] sm:$0xff] }
  0x7d   :  { %3733 = vmatprep.mubr.msk.f32.mxu1 %vm4363_vm0, %v4364_v4  ;;  %4091 = vmatpush3.bf16.msra.mxu1 %v4090_v12 }
  0x7e   :  { %4092 = vmatprep.subr.bf16.mxu1 %v4362_v1 }
  0x7f   :  { %v255_v8 = vpop.permute.xlu0 %254 }
  0x80   :  { %3739 = vmatmul.mubr.msk.f32.vlgmr.msra.gmra.mrb[0].mxu0 %vm256_vm2, %v255_v8  ;;  %v416_v41 = vpop.permute.xlu1 %415 }
  0x81   :  { %3742 = vmatpush3.msra.mxu0 %v4506_v6  ;;  %3743 = vmatprep.mubr.msk.f32.mxu0 %vm4363_vm0, %v4364_v4 }
  0x82   :  { %3751 = vmatprep.subr.mxu0 %v4364_v4  ;;  %4094 = vmatpush3.bf16.msra.mxu1 %v4093_v16 }
  0x83   :  { %v496_v13 = vpop.permute.xlu0 %495  ;;  %3746 = vmatprep.subr.mxu1 %v4364_v4 }
  0x84   :  { %3744 = vmatmul.mubr.msk.f32.vlgmr.msra.gmra.mrb[2].mxu0 %vm256_vm2, %v336_v9  ;;  %v576_v43 = vpop.permute.xlu1 %575  ;;  %v3476_v9 = vld [vmem:[%s5074_s27 + $0x50] sm:$0xff] }
  0x85   :  { %3752 = vmatpush3.msra.mxu0 %v4506_v6  ;;  %3753 = vmatprep.mubr.msk.f32.mxu0 %vm4363_vm0, %v4364_v4  ;;  %v4678_v11 = vpack.c.bf16 %v3477_v10, %v3476_v9 }
  0x86   :  { %3761 = vmatprep.subr.mxu0 %v4364_v4 }
  0x87   :  { %v656_v17 = vpop.permute.xlu0 %655 }
  0x88   :  { %3754 = vmatmul.mubr.msk.f32.vlgmr.msra.gmra.mrb[4].mxu0 %vm256_vm2, %v496_v13  ;;  %v736_v44 = vpop.permute.xlu1 %735 }
  0x89   :  { %3762 = vmatpush3.msra.mxu0 %v4506_v6  ;;  %3763 = vmatprep.mubr.msk.f32.mxu0 %vm4363_vm0, %v4364_v4 }
  0x8a   :  { %3771 = vmatprep.subr.mxu0 %v4364_v4 }
  0x8b   :  { %v816_v18 = vpop.permute.xlu0 %815 }
  0x8c   :  { %3764 = vmatmul.mubr.msk.f32.vlgmr.msra.gmra.mrb[6].mxu0 %vm256_vm2, %v656_v17  ;;  %v896_v45 = vpop.permute.xlu1 %895 }
  0x8d   :  { %3772 = vmatpush3.msra.mxu0 %v4506_v6  ;;  %3773 = vmatprep.mubr.msk.f32.mxu0 %vm4363_vm0, %v4364_v4 }
  0x8e   :  { %3781 = vmatprep.subr.mxu0 %v4364_v4 }
  0x8f   :  { %v976_v19 = vpop.permute.xlu0 %975 }
  0x90   :  { %3774 = vmatmul.mubr.msk.f32.vlgmr.msra.gmra.mrb[8].mxu0 %vm256_vm2, %v816_v18 }
  0x91   :  { %3782 = vmatpush3.msra.mxu0 %v4506_v6  ;;  %3783 = vmatprep.mubr.msk.f32.mxu0 %vm4363_vm0, %v4364_v4 }
  0x92   :  { %4123 = vmatprep.subr.bf16.mxu0 %v4362_v1 }
  0x94   :  { %3784 = vmatmul.mubr.msk.f32.vlgmr.msra.gmra.mrb[10].mxu0 %vm256_vm2, %v976_v19 }
  0x95   :  { %3838 = vmatprep.mubr.msk.f32.mxu0 %vm4363_vm0, %v4364_v4  ;;  %4125 = vmatpush3.bf16.msra.mxu0 %v4574_v22 }
  0x96   :  { %4126 = vmatprep.subr.bf16.mxu0 %v4362_v1 }
  0x99   :  { %4129 = vmatpush3.bf16.msk.msra.mxu0 %vm4587_vm5, %v4584_v25 }
  0x9a   :  { %4130 = vmatprep.subr.bf16.mxu0 %v4362_v1 }
 0x14f   :  { %v150_v28 = vpop.f32.mrb[0].mxu1 }
 0x150   :  { %v151_v29 = vadd.f32 %v3439_v27, %v150_v28  ;;  %v3724_v30 = vpop.f32.mrb[1].mxu1 }
 0x152   :  { %v155_v31 = vmin.f32 %v151_v29, 0.0  ;;  %vm154_vm7 = vcmp.gt.f32.partialorder %v151_v29, 0.0 }
 0x153   :  { %v325_v32 = vpop.f32.mrb[0].mxu0 }
 0x154   :  { %v156_v33 = vmul.f32 1.442695, %v155_v31  ;;  %v3740_v34 = vpop.f32.mrb[1].mxu0  ;;  %v326_v36 = vadd.f32 %v4601_v35, %v325_v32 }
 0x156   :  { %4318 = vpow2.f32 %v156_v33  ;;  %v330_v38 = vmin.f32 %v326_v36, 0.0  ;;  %vm329_vm8 = vcmp.gt.f32.partialorder %v326_v36, 0.0 }
 0x157   :  { %v405_v52 = vpop.f32.mrb[2].mxu0 }
 0x158   :  { %v331_v42 = vmul.f32 1.442695, %v330_v38  ;;  %v406_v53 = vadd.f32 %v4601_v35, %v405_v52  ;;  %v3745_v54 = vpop.f32.mrb[3].mxu0 }
 0x15a   :  { %4320 = vpow2.f32 %v331_v42  ;;  %v410_v55 = vmin.f32 %v406_v53, 0.0  ;;  %vm409_vm10 = vcmp.gt.f32.partialorder %v406_v53, 0.0 }
 0x15b   :  { %v565_v57 = vpop.f32.mrb[4].mxu0 }
 0x15c   :  { %v411_v56 = vmul.f32 1.442695, %v410_v55  ;;  %v3755_v58 = vpop.f32.mrb[5].mxu0  ;;  %v566_v18 = vadd.f32 %v4601_v35, %v565_v57 }
 0x15e   :  { %4322 = vpow2.f32 %v411_v56  ;;  %v570_v23 = vmin.f32 %v566_v18, 0.0  ;;  %vm569_vm12 = vcmp.gt.f32.partialorder %v566_v18, 0.0 }
 0x15f   :  { %v725_v3 = vpop.f32.mrb[6].mxu0 }
 0x160   :  { %v4319_v37 = vpop.eup %4318  ;;  %v3765_v5 = vpop.f32.mrb[7].mxu0  ;;  %v571_v30 = vmul.f32 1.442695, %v570_v23  ;;  %v2287_v23 = vld [vmem:[%s5046_s9 + $0x8] sm:$0xff] }
 0x161   :  { %v3441_v39 = vadd.f32 -1.0, %v4319_v37 }
 0x163   :  { %v159_v40 = vsel %vm154_vm7, %v151_v29, %v3441_v39  ;;  %v4684_v12 = vpop.f32.mrb[8].mxu0  ;;  %v4694_v39 = vadd.f32 %v4601_v35, %v725_v3 }
 0x164   :  { %3734 = vmatmul.mubr.msk.f32.vlgmr.msra.gmra.mrb[2].mxu1 %vm171_vm6, %v159_v40  ;;  %v4321_v46 = vpop.eup %4320  ;;  %v3775_v13 = vpop.f32.mrb[9].mxu0  ;;  %v3480_v40 = vld [vmem:[%s5074_s27 + $0x60] sm:$0xff]  ;;  %v4741_v59 = vadd.f32 %v4601_v35, %v4684_v12 }
 0x165   :  { %3747 = vmatpush3.msra.mxu1 %v4506_v6  ;;  %3748 = vmatprep.mubr.msk.f32.mxu1 %vm4363_vm0, %v4364_v4  ;;  %v3446_v47 = vadd.f32 -1.0, %v4321_v46  ;;  %v3482_v46 = vld [vmem:[%s5074_s27 + $0x70] sm:$0xff]  ;;  %vm729_vm14 = vcmp.gt.f32.partialorder %v4694_v39, 0.0 }
 0x166   :  { %3756 = vmatprep.subr.mxu1 %v4364_v4  ;;  %vm889_vm3 = vcmp.gt.f32.partialorder %v4741_v59, 0.0 }
 0x167   :  { %v334_v50 = vsel %vm329_vm8, %v326_v36, %v3446_v47  ;;  %v4686_v14 = vpop.f32.mrb[10].mxu0  ;;  %v3483_v47 = vld [vmem:[%s5074_s27 + $0x78] sm:$0x3f] }
 0x168   :  { %3749 = vmatmul.mubr.msk.f32.vlgmr.msra.gmra.mrb[4].mxu1 %vm256_vm2, %v416_v41  ;;  %v4323_v62 = vpop.eup %4322  ;;  %v3785_v15 = vpop.f32.mrb[11].mxu0  ;;  %v3481_v41 = vld [vmem:[%s5074_s27 + $0x68] sm:$0xff]  ;;  %v1046_v13 = vadd.f32 %v4601_v35, %v4686_v14 }
 0x169   :  { %3757 = vmatpush3.msra.mxu1 %v4506_v6  ;;  %3758 = vmatprep.mubr.msk.f32.mxu1 %vm4363_vm0, %v4364_v4  ;;  %v3448_v63 = vadd.f32 -1.0, %v4323_v62  ;;  %v890_v62 = vmin.f32 %v4741_v59, 0.0 }
 0x16a   :  { %3766 = vmatprep.subr.mxu1 %v4364_v4  ;;  %vm1049_vm8 = vcmp.gt.f32.partialorder %v1046_v13, 0.0 }
 0x16b   :  { %v414_v2 = vsel %vm409_vm10, %v406_v53, %v3448_v63  ;;  %v891_v3 = vmul.f32 1.442695, %v890_v62 }
 0x16c   :  { %3759 = vmatmul.mubr.msk.f32.vlgmr.msra.gmra.mrb[6].mxu1 %vm256_vm2, %v576_v43 }
 0x16d   :  { %3767 = vmatpush3.msra.mxu1 %v4506_v6  ;;  %3768 = vmatprep.mubr.msk.f32.mxu1 %vm4363_vm0, %v4364_v4 }
 0x16e   :  { %3776 = vmatprep.subr.mxu1 %v4364_v4 }
 0x170   :  { %3769 = vmatmul.mubr.msk.f32.vlgmr.msra.gmra.mrb[8].mxu1 %vm256_vm2, %v736_v44  ;;  %v4702_v44 = vpack.c.bf16 %v3481_v41, %v3480_v40 }
 0x171   :  { %3777 = vmatpush3.msra.mxu1 %v4506_v6  ;;  %3778 = vmatprep.mubr.msk.f32.mxu1 %vm4363_vm0, %v4364_v4  ;;  %v3474_v6 = vld [vmem:[%s5074_s27 + $0x40] sm:$0xff] }
 0x172   :  { %4095 = vmatprep.subr.bf16.mxu1 %v4362_v1  ;;  %v4668_v8 = vpack.c.bf16 %v3475_v7, %v3474_v6 }
 0x174   :  { %3779 = vmatmul.mubr.msk.f32.vlgmr.msra.gmra.mrb[10].mxu1 %vm256_vm2, %v896_v45  ;;  %v730_v45 = vmin.f32 %v4694_v39, 0.0 }
 0x175   :  { %4097 = vmatpush3.bf16.msra.mxu1 %v4574_v22  ;;  %3794 = vmatprep.mubr.msk.f32.mxu1 %vm4363_vm0, %v4364_v4 }
 0x176   :  { %4098 = vmatprep.subr.bf16.mxu1 %v4362_v1  ;;  %v731_v52 = vmul.f32 1.442695, %v730_v45  ;;  %v3519_v45 = vld [vmem:[%s5046_s9 + $0x28] sm:$0xf] }
 0x179   :  { %4101 = vmatpush3.bf16.msk.msra.mxu1 %vm4587_vm5, %v4584_v25 }
 0x17a   :  { %4102 = vmatprep.subr.bf16.mxu1 %v4362_v1 }
 0x17c   :  { %3795 = vmatmul.mubr.msk.f32.vlgmr.msra.gmra.mrb[12].mxu1 %vm1060_vm9, %v334_v50  ;;  %v4715_v50 = vpack.c.bf16 %v3483_v47, %v3482_v46 }
 0x17d   :  { %4104 = vmatpush3.bf16.msra.mxu1 %v4638_v51  ;;  %3805 = vmatprep.mubr.msk.f32.mxu1 %vm4363_vm0, %v4364_v4 }
 0x17e   :  { %4105 = vmatprep.subr.bf16.mxu1 %v4362_v1 }
 0x181   :  { %4108 = vmatpush3.bf16.msk.msra.mxu1 %vm4587_vm5, %v4653_v61 }
 0x182   :  { %4109 = vmatprep.subr.bf16.mxu1 %v4362_v1 }
 0x184   :  { %3806 = vmatmul.mubr.msk.f32.vlgmr.msra.gmra.mrb[12].mxu1 %vm1060_vm9, %v414_v2 }
 0x185   :  { %3816 = vmatprep.mubr.msk.f32.mxu1 %vm4363_vm0, %v4364_v4  ;;  %4111 = vmatpush3.bf16.msra.mxu1 %v4668_v8 }
 0x186   :  { %4112 = vmatprep.subr.bf16.mxu1 %v4362_v1 }
 0x189   :  { %4115 = vmatpush3.bf16.msk.msra.mxu1 %vm4587_vm5, %v4678_v11 }
 0x18a   :  { %4116 = vmatprep.subr.bf16.mxu1 %v4362_v1 }
 0x237   :  { %v4688_v16 = vpop.f32.mrb[2].mxu1 }
 0x238   :  { %v3735_v17 = vpop.f32.mrb[3].mxu1 }
 0x23b   :  { %v485_v19 = vpop.f32.mrb[4].mxu1 }
 0x23c   :  { %v486_v20 = vadd.f32 %v4601_v35, %v485_v19  ;;  %v3750_v21 = vpop.f32.mrb[5].mxu1 }
 0x23d   :  { %v2286_v21 = vld [vmem:[%s5046_s9] sm:$0xff] }
 0x23e   :  { %v490_v24 = vmin.f32 %v486_v20, 0.0  ;;  %vm489_vm11 = vcmp.gt.f32.partialorder %v486_v20, 0.0 }
 0x23f   :  { %v645_v27 = vpop.f32.mrb[6].mxu1 }
 0x240   :  { %v491_v28 = vmul.f32 1.442695, %v490_v24  ;;  %v3760_v29 = vpop.f32.mrb[7].mxu1  ;;  %v646_v31 = vadd.f32 %v4601_v35, %v645_v27  ;;  %v4208_v24 = vpack.c.bf16 %v2287_v23, %v2286_v21  ;;  %v3467_v27 = vld [vmem:[%s5047_s8] ss:$0 sm:$0xff] }
 0x242   :  { %4324 = vpow2.f32 %v491_v28  ;;  %v650_v34 = vmin.f32 %v646_v31, 0.0  ;;  %vm649_vm13 = vcmp.gt.f32.partialorder %v646_v31, 0.0 }
 0x243   :  { %v805_v32 = vpop.f32.mrb[8].mxu1  ;;  %4326 = vpow2.f32 %v571_v30 }
 0x244   :  { %v3770_v33 = vpop.f32.mrb[9].mxu1  ;;  %v651_v38 = vmul.f32 1.442695, %v650_v34  ;;  %v4718_v53 = vadd.f32 %v4601_v35, %v805_v32  ;;  %v3518_v34 = vld [vmem:[%s5046_s9 + $0x20] sm:$0xff] }
 0x245   :  { %v3517_v33 = vld [vmem:[%s5046_s9 + $0x18] sm:$0xff] }
 0x246   :  { %4328 = vpow2.f32 %v651_v38  ;;  %v810_v55 = vmin.f32 %v4718_v53, 0.0  ;;  %vm809_vm15 = vcmp.gt.f32.partialorder %v4718_v53, 0.0  ;;  %v4211_v41 = vpack.c.bf16 %v3518_v34, %v3517_v33 }
 0x247   :  { %v965_v36 = vpop.f32.mrb[10].mxu1  ;;  %4330 = vpow2.f32 %v731_v52 }
 0x248   :  { %v3780_v37 = vpop.f32.mrb[11].mxu1  ;;  %v811_v58 = vmul.f32 1.442695, %v810_v55  ;;  %v4763_v5 = vadd.f32 %v4601_v35, %v965_v36 }
 0x24a   :  { %4332 = vpow2.f32 %v811_v58  ;;  %v970_v7 = vmin.f32 %v4763_v5, 0.0  ;;  %vm969_vm7 = vcmp.gt.f32.partialorder %v4763_v5, 0.0 }
 0x24b   :  { %4334 = vpow2.f32 %v891_v3 }
 0x24c   :  { %v4325_v42 = vpop.eup %4324  ;;  %v971_v12 = vmul.f32 1.442695, %v970_v7 }
 0x24d   :  { %v3450_v43 = vadd.f32 -1.0, %v4325_v42  ;;  %v4327_v49 = vpop.eup %4326 }
 0x24e   :  { %v3452_v54 = vadd.f32 -1.0, %v4327_v49  ;;  %4336 = vpow2.f32 %v971_v12 }
 0x24f   :  { %v494_v48 = vsel %vm489_vm11, %v486_v20, %v3450_v43 }
 0x250   :  { %3817 = vmatmul.mubr.msk.f32.vlgmr.msra.gmra.mrb[12].mxu1 %vm1060_vm9, %v494_v48  ;;  %3839 = vmatmul.mubr.msk.f32.vlgmr.msra.gmra.mrb[12].mxu0 %vm1060_vm9, %v494_v48  ;;  %v574_v56 = vsel %vm569_vm12, %v566_v18, %v3452_v54  ;;  %v4329_v57 = vpop.eup %4328 }
 0x251   :  { %4118 = vmatpush3.bf16.msra.mxu1 %v4702_v44  ;;  %4132 = vmatpush3.bf16.msra.mxu0 %v4638_v51  ;;  %v3454_v60 = vadd.f32 -1.0, %v4329_v57  ;;  %v4331_v2 = vpop.eup %4330 }
 0x252   :  { %4119 = vmatprep.subr.bf16.mxu1 %v4362_v1  ;;  %4133 = vmatprep.subr.bf16.mxu0 %v4362_v1  ;;  %v3456_v6 = vadd.f32 -1.0, %v4331_v2  ;;  %v3442_v2 = vld [vmem:[%s5048_s4] ss:$0 sm:$0xff] }
 0x253   :  { %3827 = vmatprep.mubr.msk.f32.mxu1 %vm4363_vm0, %v4364_v4  ;;  %3849 = vmatprep.mubr.msk.f32.mxu0 %vm4363_vm0, %v4364_v4  ;;  %v654_v63 = vsel %vm649_vm13, %v646_v31, %v3454_v60  ;;  %v242_v3 = vadd.f32 %v3442_v2, %v4688_v16  ;;  %v3255_v2 = vld [vmem:[%s5055_s17] sm:$0xff] }
 0x254   :  { %v734_v9 = vsel %vm729_vm14, %v4694_v39, %v3456_v6  ;;  %v4333_v10 = vpop.eup %4332  ;;  %v3019_v6 = vld [vmem:[%s5049_s14 + $0x8] sm:$0xff]  ;;  %vm2770_vm14 = vcmask 1041408  }
 0x255   :  { %4122 = vmatpush3.bf16.msk.msra.mxu1 %vm4587_vm5, %v4715_v50  ;;  %4136 = vmatpush3.bf16.msk.msra.mxu0 %vm4587_vm5, %v4653_v61  ;;  %v3458_v15 = vadd.f32 -1.0, %v4333_v10  ;;  %v4335_v14 = vpop.eup %4334 }
 0x256   :  { %4137 = vmatprep.subr.bf16.mxu0 %v4362_v1  ;;  %4151 = vmatprep.subr.bf16.mxu1 %v4362_v1 }
 0x257   :  { %v814_v35 = vsel %vm809_vm15, %v4718_v53, %v3458_v15  ;;  %v2765_v15 = vld [vmem:[%s5050_s11 + $0x8] sm:$0x3]  ;;  %vm4928_vm15 = vmpackc.low %vm2770_vm14, %vm4376_vm4  ;;  %vm2766_vm4 = vcmask 80896  }
 0x258   :  { %3828 = vmatmul.mubr.msk.f32.vlgmr.msra.gmra.mrb[12].mxu1 %vm1060_vm9, %v574_v56  ;;  %3850 = vmatmul.mubr.msk.f32.vlgmr.msra.gmra.mrb[12].mxu0 %vm1060_vm9, %v574_v56  ;;  %v4337_v18 = vpop.eup %4336 }
 0x259   :  { %4139 = vmatpush3.bf16.msra.mxu0 %v4668_v8  ;;  %4153 = vmatpush3.bf16.msra.mxu1 %v4574_v22 }
 0x25a   :  { %4140 = vmatprep.subr.bf16.mxu0 %v4362_v1  ;;  %4154 = vmatprep.subr.bf16.mxu1 %v4362_v1 }
 0x25b   :  { %3882 = vmatprep.mubr.msk.f32.mxu1 %vm4363_vm0, %v4364_v4  ;;  %3860 = vmatprep.mubr.msk.f32.mxu0 %vm4363_vm0, %v4364_v4 }
 0x25d   :  { %4143 = vmatpush3.bf16.msk.msra.mxu0 %vm4587_vm5, %v4678_v11  ;;  %4157 = vmatpush3.bf16.msk.msra.mxu1 %vm4587_vm5, %v4584_v25 }
 0x25e   :  { %4144 = vmatprep.subr.bf16.mxu0 %v4362_v1  ;;  %4158 = vmatprep.subr.bf16.mxu1 %v4362_v1 }
 0x260   :  { %3883 = vmatmul.mubr.msk.f32.vlgmr.msra.gmra.mrb[14].mxu1 %vm1060_vm9, %v654_v63  ;;  %3861 = vmatmul.mubr.msk.f32.vlgmr.msra.gmra.mrb[12].mxu0 %vm1060_vm9, %v654_v63 }
 0x261   :  { %4146 = vmatpush3.bf16.msra.mxu0 %v4702_v44  ;;  %4160 = vmatpush3.bf16.msra.mxu1 %v4638_v51 }
 0x262   :  { %4147 = vmatprep.subr.bf16.mxu0 %v4362_v1  ;;  %4161 = vmatprep.subr.bf16.mxu1 %v4362_v1 }
 0x263   :  { %3893 = vmatprep.mubr.msk.f32.mxu1 %vm4363_vm0, %v4364_v4  ;;  %3871 = vmatprep.mubr.msk.f32.mxu0 %vm4363_vm0, %v4364_v4 }
 0x265   :  { %4150 = vmatpush3.bf16.msk.msra.mxu0 %vm4587_vm5, %v4715_v50  ;;  %4164 = vmatpush3.bf16.msk.msra.mxu1 %vm4587_vm5, %v4653_v61 }
 0x266   :  { %4165 = vmatprep.subr.bf16.mxu1 %v4362_v1  ;;  %4179 = vmatprep.subr.bf16.mxu0 %v4362_v1 }
 0x268   :  { %3894 = vmatmul.mubr.msk.f32.vlgmr.msra.gmra.mrb[14].mxu1 %vm1060_vm9, %v734_v9  ;;  %3872 = vmatmul.mubr.msk.f32.vlgmr.msra.gmra.mrb[12].mxu0 %vm1060_vm9, %v734_v9 }
 0x269   :  { %4167 = vmatpush3.bf16.msra.mxu1 %v4668_v8  ;;  %4181 = vmatpush3.bf16.msra.mxu0 %v4574_v22  ;;  %v1050_v22 = vmin.f32 %v1046_v13, 0.0 }
 0x26a   :  { %4168 = vmatprep.subr.bf16.mxu1 %v4362_v1  ;;  %4182 = vmatprep.subr.bf16.mxu0 %v4362_v1 }
 0x26b   :  { %3904 = vmatprep.mubr.msk.f32.mxu1 %vm4363_vm0, %v4364_v4  ;;  %3926 = vmatprep.mubr.msk.f32.mxu0 %vm4363_vm0, %v4364_v4  ;;  %v1051_v17 = vmul.f32 1.442695, %v1050_v22 }
 0x26d   :  { %4171 = vmatpush3.bf16.msk.msra.mxu1 %vm4587_vm5, %v4678_v11  ;;  %4185 = vmatpush3.bf16.msk.msra.mxu0 %vm4587_vm5, %v4584_v25  ;;  %v3460_v25 = vadd.f32 -1.0, %v4335_v14  ;;  %4338 = vpow2.f32 %v1051_v17  ;;  %v3516_v14 = vld [vmem:[%s5051_s10] ss:$0 sm:$0xff] }
 0x26e   :  { %4172 = vmatprep.subr.bf16.mxu1 %v4362_v1  ;;  %4186 = vmatprep.subr.bf16.mxu0 %v4362_v1 }
 0x270   :  { %3905 = vmatmul.mubr.msk.f32.vlgmr.msra.gmra.mrb[14].mxu1 %vm1060_vm9, %v814_v35  ;;  %3927 = vmatmul.mubr.msk.f32.vlgmr.msra.gmra.mrb[14].mxu0 %vm1060_vm9, %v814_v35  ;;  %v3548_v35 = vld [vmem:[%s5056_s16] ss:$0 sm:$0xff] }
 0x271   :  { %4174 = vmatpush3.bf16.msra.mxu1 %v4702_v44  ;;  %4188 = vmatpush3.bf16.msra.mxu0 %v4638_v51  ;;  %v894_v51 = vsel %vm889_vm3, %v4741_v59, %v3460_v25 }
 0x272   :  { %4175 = vmatprep.subr.bf16.mxu1 %v4362_v1  ;;  %4189 = vmatprep.subr.bf16.mxu0 %v4362_v1 }
 0x273   :  { %3915 = vmatprep.mubr.msk.f32.mxu1 %vm4363_vm0, %v4364_v4  ;;  %3937 = vmatprep.mubr.msk.f32.mxu0 %vm4363_vm0, %v4364_v4 }
 0x275   :  { %4178 = vmatpush3.bf16.msk.msra.mxu1 %vm4587_vm5, %v4715_v50  ;;  %4192 = vmatpush3.bf16.msk.msra.mxu0 %vm4587_vm5, %v4653_v61  ;;  %v3462_v61 = vadd.f32 -1.0, %v4337_v18 }
 0x276   :  { %4193 = vmatprep.subr.bf16.mxu0 %v4362_v1  ;;  %4207 = vmatprep.subr.bf16.mxu1 %v4362_v1 }
 0x277   :  { %v974_v19 = vsel %vm969_vm7, %v4763_v5, %v3462_v61  ;;  %v3018_v5 = vld [vmem:[%s5049_s14] sm:$0xff] }
 0x278   :  { %3916 = vmatmul.mubr.msk.f32.vlgmr.msra.gmra.mrb[14].mxu1 %vm1060_vm9, %v894_v51  ;;  %3938 = vmatmul.mubr.msk.f32.vlgmr.msra.gmra.mrb[14].mxu0 %vm1060_vm9, %v894_v51  ;;  %v4238_v10 = vpack.c.bf16 %v3019_v6, %v3018_v5  ;;  %v3257_v6 = vld [vmem:[%s5055_s17 + $0x10] sm:$0xff] }
 0x279   :  { %4195 = vmatpush3.bf16.msra.mxu0 %v4668_v8  ;;  %3948 = vmatprep.mubr.msk.f32.mxu0 %vm4363_vm0, %v4364_v4  ;;  %v4339_v8 = vpop.eup %4338 }
 0x27a   :  { %4196 = vmatprep.subr.bf16.mxu0 %v4362_v1  ;;  %3968 = vmatprep.mubr.msk.f32.mxu1 %vm4363_vm0, %v4364_v4  ;;  %v3464_v20 = vadd.f32 -1.0, %v4339_v8  ;;  %v3537_v8 = vld [vmem:[%s5050_s11 + $0x18] sm:$0x3] }
 0x27b   :  { %4209 = vmatpush3.bf16.msra.mxu1 %v4208_v24 }
 0x27c   :  { %3966 = vmatprep.subr.mxu1 %v4364_v4 }
 0x27d   :  { %4199 = vmatpush3.bf16.msk.msra.mxu0 %vm4587_vm5, %v4678_v11  ;;  %v1054_v11 = vsel %vm1049_vm8, %v1046_v13, %v3464_v20  ;;  %v2764_v13 = vld [vmem:[%s5050_s11] sm:$0xff] }
 0x27e   :  { %4200 = vmatprep.subr.bf16.mxu0 %v4362_v1  ;;  %v4226_v22 = vpack.c.bf16 %v2765_v15, %v2764_v13  ;;  %v3262_v13 = vld [vmem:[%s5055_s17 + $0x38] sm:$0xff] }
 0x280   :  { %3949 = vmatmul.mubr.msk.f32.vlgmr.msra.gmra.mrb[14].mxu0 %vm1060_vm9, %v974_v19  ;;  %v3536_v19 = vld [vmem:[%s5050_s11 + $0x10] sm:$0xff] }
 0x281   :  { %4202 = vmatpush3.bf16.msra.mxu0 %v4702_v44  ;;  %3959 = vmatprep.mubr.msk.f32.mxu0 %vm4363_vm0, %v4364_v4 }
 0x282   :  { %4203 = vmatprep.subr.bf16.mxu0 %v4362_v1 }
 0x285   :  { %4206 = vmatpush3.bf16.msk.msra.mxu0 %vm4587_vm5, %v4715_v50  ;;  %vm2293_vm5 = vcmask 1043456  }
 0x286   :  { %4213 = vmatprep.subr.bf16.mxu0 %v4362_v1  ;;  %3967 = vmatpush3.msk.msra.mxu1 %vm2293_vm5, %v2288_v26 }
 0x287   :  { %4210 = vmatprep.subr.bf16.mxu1 %v4362_v1 }
 0x288   :  { %3960 = vmatmul.mubr.msk.f32.vlgmr.msra.gmra.mrb[14].mxu0 %vm1060_vm9, %v1054_v11  ;;  %vm2289_vm9 = vcmask 162816  }
 0x289   :  { %3986 = vmatprep.mubr.msk.f32.mxu0 %vm4363_vm0, %v4364_v4  ;;  %4215 = vmatpush3.bf16.msra.mxu0 %v4208_v24 }
 0x28a   :  { %3984 = vmatprep.subr.mxu0 %v4364_v4 }
 0x28d   :  { %3985 = vmatpush3.msk.msra.mxu0 %vm2293_vm5, %v2288_v26 }
 0x28e   :  { %4216 = vmatprep.subr.bf16.mxu0 %v4362_v1 }
 0x32b   :  { %v1386_v28 = vpop.f32.mrb[12].mxu1 }
 0x32c   :  { %v4261_v29 = vadd.f32 %v3467_v27, %v1386_v28  ;;  %v3829_v30 = vpop.f32.mrb[13].mxu1 }
 0x32d   :  { %v3540_v30 = vld [vmem:[%s5050_s11 + $0x20] sm:$0xff] }
 0x32e   :  { %v1392_v31 = vmin.f32 %v4261_v29, 0.0  ;;  %vm1391_vm10 = vcmp.gt.f32.partialorder %v4261_v29, 0.0 }
 0x330   :  { %v1393_v32 = vmul.f32 1.442695, %v1392_v31  ;;  %v3541_v31 = vld [vmem:[%s5050_s11 + $0x28] sm:$0x3] }
 0x332   :  { %4340 = vpow2.f32 %v1393_v32 }
 0x33b   :  { %v1682_v36 = vpop.f32.mrb[12].mxu0 }
 0x33c   :  { %v4341_v37 = vpop.eup %4340  ;;  %v4262_v38 = vadd.f32 %v3467_v27, %v1682_v36  ;;  %v3873_v39 = vpop.f32.mrb[13].mxu0 }
 0x33d   :  { %v3486_v40 = vadd.f32 -1.0, %v4341_v37 }
 0x33e   :  { %v1688_v42 = vmin.f32 %v4262_v38, 0.0  ;;  %vm1687_vm11 = vcmp.gt.f32.partialorder %v4262_v38, 0.0 }
 0x33f   :  { %v1396_v43 = vsel %vm1391_vm10, %v4261_v29, %v3486_v40 }
 0x340   :  { %v1689_v44 = vmul.f32 1.442695, %v1688_v42  ;;  %3969 = vmatmul.mubr.msk.f32.vlgmr.msra.gmra.mrb[16].mxu1 %vm2289_vm9, %v1396_v43 }
 0x341   :  { %4212 = vmatpush3.bf16.msra.mxu1 %v4211_v41  ;;  %3977 = vmatprep.mubr.msk.f32.mxu1 %vm4363_vm0, %v4364_v4 }
 0x342   :  { %4342 = vpow2.f32 %v1689_v44  ;;  %3975 = vmatprep.subr.mxu1 %v4364_v4 }
 0x345   :  { %3976 = vmatpush3.msk.msra.mxu1 %vm2293_vm5, %v3519_v45 }
 0x346   :  { %4219 = vmatprep.subr.bf16.mxu1 %v4362_v1 }
 0x34b   :  { %v1978_v46 = vpop.f32.mrb[14].mxu1 }
 0x34c   :  { %v4343_v47 = vpop.eup %4342  ;;  %v4263_v48 = vadd.f32 %v3467_v27, %v1978_v46  ;;  %v3917_v49 = vpop.f32.mrb[15].mxu1  ;;  %v3017_v46 = vld [vmem:[%s5052_s13] sm:$0xff] }
 0x34d   :  { %v3495_v50 = vadd.f32 -1.0, %v4343_v47  ;;  %v3166_v49 = vld [vmem:[%s5053_s15 + $0x8] sm:$0xff] }
 0x34e   :  { %v1984_v52 = vmin.f32 %v4263_v48, 0.0  ;;  %vm1983_vm12 = vcmp.gt.f32.partialorder %v4263_v48, 0.0 }
 0x34f   :  { %v1692_v53 = vsel %vm1687_vm11, %v4262_v38, %v3495_v50  ;;  %v4234_v38 = vpack.c.bf16 %v3541_v31, %v3540_v30 }
 0x350   :  { %v1985_v54 = vmul.f32 1.442695, %v1984_v52  ;;  %3978 = vmatmul.mubr.msk.f32.vlgmr.msra.gmra.mrb[16].mxu1 %vm2289_vm9, %v1692_v53  ;;  %3987 = vmatmul.mubr.msk.f32.vlgmr.msra.gmra.mrb[16].mxu0 %vm2289_vm9, %v1692_v53  ;;  %v3535_v52 = vld [vmem:[%s5054_s12] ss:$0 sm:$0xff] }
 0x351   :  { %4218 = vmatpush3.bf16.msra.mxu0 %v4211_v41  ;;  %4221 = vmatpush3.bf16.msra.mxu1 %v4208_v24 }
 0x352   :  { %4344 = vpow2.f32 %v1985_v54  ;;  %3993 = vmatprep.subr.mxu0 %v4364_v4  ;;  %4002 = vmatprep.subr.mxu1 %v4364_v4 }
 0x353   :  { %3995 = vmatprep.mubr.msk.f32.mxu0 %vm4363_vm0, %v4364_v4  ;;  %4004 = vmatprep.mubr.msk.f32.mxu1 %vm4363_vm0, %v4364_v4 }
 0x355   :  { %3994 = vmatpush3.msk.msra.mxu0 %vm2293_vm5, %v3519_v45  ;;  %4003 = vmatpush3.msk.msra.mxu1 %vm2293_vm5, %v2288_v26  ;;  %v4230_v26 = vpack.c.bf16 %v3537_v8, %v3536_v19 }
 0x356   :  { %4222 = vmatprep.subr.bf16.mxu1 %v4362_v1  ;;  %4225 = vmatprep.subr.bf16.mxu0 %v4362_v1 }
 0x35b   :  { %v2274_v55 = vpop.f32.mrb[14].mxu0 }
 0x35c   :  { %v4345_v56 = vpop.eup %4344  ;;  %v4264_v57 = vadd.f32 %v3467_v27, %v2274_v55  ;;  %v3961_v58 = vpop.f32.mrb[15].mxu0 }
 0x35d   :  { %v3504_v59 = vadd.f32 -1.0, %v4345_v56 }
 0x35e   :  { %v2280_v60 = vmin.f32 %v4264_v57, 0.0  ;;  %vm2279_vm13 = vcmp.gt.f32.partialorder %v4264_v57, 0.0 }
 0x35f   :  { %v1988_v62 = vsel %vm1983_vm12, %v4263_v48, %v3504_v59  ;;  %v3165_v48 = vld [vmem:[%s5053_s15] sm:$0xff] }
 0x360   :  { %v2281_v63 = vmul.f32 1.442695, %v2280_v60  ;;  %3996 = vmatmul.mubr.msk.f32.vlgmr.msra.gmra.mrb[16].mxu0 %vm2289_vm9, %v1988_v62  ;;  %4005 = vmatmul.mubr.msk.f32.vlgmr.msra.gmra.mrb[18].mxu1 %vm2289_vm9, %v1988_v62  ;;  %v4241_v50 = vpack.c.bf16 %v3166_v49, %v3165_v48 }
 0x361   :  { %4224 = vmatpush3.bf16.msra.mxu1 %v4211_v41  ;;  %4013 = vmatprep.mubr.msk.f32.mxu1 %vm4363_vm0, %v4364_v4 }
 0x362   :  { %4346 = vpow2.f32 %v2281_v63  ;;  %4011 = vmatprep.subr.mxu1 %v4364_v4  ;;  %4020 = vmatprep.mubr.msk.f32.mxu0 %vm4363_vm0, %v4364_v4 }
 0x363   :  { %4348 = vtanh.f32 %v242_v3  ;;  %4228 = vmatpush3.bf16.msk.msra.mxu0 %vm4928_vm15, %v4226_v22  ;;  %v3256_v3 = vld [vmem:[%s5055_s17 + $0x8] sm:$0xff] }
 0x364   :  { %4229 = vmatprep.subr.bf16.mxu0 %v4362_v1  ;;  %v4244_v5 = vpack.c.bf16 %v3256_v3, %v3255_v2 }
 0x365   :  { %4012 = vmatpush3.msk.msra.mxu1 %vm2293_vm5, %v3519_v45 }
 0x366   :  { %4237 = vmatprep.subr.bf16.mxu1 %v4362_v1 }
 0x36c   :  { %v4347_v7 = vpop.eup %4346 }
 0x36d   :  { %v3513_v9 = vadd.f32 -1.0, %v4347_v7  ;;  %v4349_v16 = vpop.eup %4348  ;;  %v3259_v7 = vld [vmem:[%s5055_s17 + $0x20] sm:$0xff] }
 0x36f   :  { %v2284_v12 = vsel %vm2279_vm13, %v4264_v57, %v3513_v9 }
 0x370   :  { %4014 = vmatmul.mubr.msk.f32.vlgmr.msra.gmra.mrb[18].mxu1 %vm2289_vm9, %v2284_v12 }
 0x371   :  { %4239 = vmatpush3.bf16.msra.mxu1 %v4238_v10  ;;  %4041 = vmatprep.mubr.msk.f32.mxu1 %vm4363_vm0, %v4364_v4  ;;  %v3260_v10 = vld [vmem:[%s5055_s17 + $0x28] sm:$0xff] }
 0x372   :  { %4240 = vmatprep.subr.bf16.mxu1 %v4362_v1  ;;  %v4250_v12 = vpack.c.bf16 %v3260_v10, %v3259_v7 }
 0x374   :  { %4042 = vmatmul.mubr.msk.f32.vlgmr.msra.gmra.mrb[20].mxu1 %vm81_vm1, %v4349_v16  ;;  %v3261_v16 = vld [vmem:[%s5055_s17 + $0x30] sm:$0xff] }
 0x375   :  { %4053 = vmatprep.mubr.msk.f32.mxu1 %vm4363_vm0, %v4364_v4  ;;  %4242 = vmatpush3.bf16.msra.mxu1 %v4241_v50  ;;  %v4253_v15 = vpack.c.bf16 %v3262_v13, %v3261_v16 }
 0x376   :  { %4255 = vmatprep.subr.bf16.mxu1 %v4362_v1 }
 0x423   :  { %v2450_v17 = vpop.f32.mrb[16].mxu1 }
 0x424   :  { %v4265_v25 = vadd.f32 %v3516_v14, %v2450_v17  ;;  %v3979_v51 = vpop.f32.mrb[17].mxu1 }
 0x426   :  { %v2456_v18 = vmin.f32 %v4265_v25, 0.0  ;;  %vm2455_vm3 = vcmp.gt.f32.partialorder %v4265_v25, 0.0 }
 0x428   :  { %v2457_v61 = vmul.f32 1.442695, %v2456_v18 }
 0x42a   :  { %4350 = vpow2.f32 %v2457_v61 }
 0x433   :  { %v2601_v20 = vpop.f32.mrb[16].mxu0 }
 0x434   :  { %v4351_v11 = vpop.eup %4350  ;;  %v4266_v21 = vadd.f32 %v3516_v14, %v2601_v20  ;;  %v3997_v23 = vpop.f32.mrb[17].mxu0  ;;  %v3350_v20 = vld [vmem:[%s5057_s19] sm:$0xff] }
 0x435   :  { %v3522_v24 = vadd.f32 -1.0, %v4351_v11  ;;  %v3351_v11 = vld [vmem:[%s5057_s19 + $0x8] sm:$0xff]  ;;  %v3352_v23 = vld [vmem:[%s5057_s19 + $0x10] sm:$0xff] }
 0x436   :  { %v2607_v27 = vmin.f32 %v4266_v21, 0.0  ;;  %vm2606_vm7 = vcmp.gt.f32.partialorder %v4266_v21, 0.0 }
 0x437   :  { %v2460_v28 = vsel %vm2455_vm3, %v4265_v25, %v3522_v24  ;;  %v3353_v24 = vld [vmem:[%s5057_s19 + $0x18] sm:$0xff] }
 0x438   :  { %v2608_v29 = vmul.f32 1.442695, %v2607_v27  ;;  %4021 = vmatmul.mubr.msk.f32.vlgmr.msra.gmra.mrb[18].mxu0 %vm2766_vm4, %v2460_v28  ;;  %v3550_v27 = vld [vmem:[%s5058_s18] ss:$0 sm:$0xff] }
 0x439   :  { %4232 = vmatpush3.bf16.msk.msra.mxu0 %vm4928_vm15, %v4230_v26  ;;  %4027 = vmatprep.mubr.msk.f32.mxu0 %vm4363_vm0, %v4364_v4  ;;  %v4259_v26 = vpack.c.bf16 %v3353_v24, %v3352_v23 }
 0x43a   :  { %4352 = vpow2.f32 %v2608_v29  ;;  %4233 = vmatprep.subr.bf16.mxu0 %v4362_v1 }
 0x443   :  { %v2752_v32 = vpop.f32.mrb[18].mxu1 }
 0x444   :  { %v4353_v33 = vpop.eup %4352  ;;  %v4267_v34 = vadd.f32 %v3516_v14, %v2752_v32  ;;  %v4015_v36 = vpop.f32.mrb[19].mxu1 }
 0x445   :  { %v3527_v37 = vadd.f32 -1.0, %v4353_v33  ;;  %v3553_v36 = vld [vmem:[%s5059_s20] ss:$0 sm:$0xff] }
 0x446   :  { %v2758_v39 = vmin.f32 %v4267_v34, 0.0  ;;  %vm2757_vm8 = vcmp.gt.f32.partialorder %v4267_v34, 0.0 }
 0x447   :  { %v2611_v40 = vsel %vm2606_vm7, %v4266_v21, %v3527_v37  ;;  %v3089_v41 = vpop.f32.mrb[20].mxu1  ;;  %v4256_v21 = vpack.c.bf16 %v3351_v11, %v3350_v20 }
 0x448   :  { %v2759_v42 = vmul.f32 1.442695, %v2758_v39  ;;  %4028 = vmatmul.mubr.msk.f32.vlgmr.msra.gmra.mrb[18].mxu0 %vm2766_vm4, %v2611_v40  ;;  %v4043_v43 = vpop.f32.mrb[21].mxu1 }
 0x449   :  { %4236 = vmatpush3.bf16.msk.msra.mxu0 %vm4928_vm15, %v4234_v38  ;;  %4034 = vmatprep.mubr.msk.f32.mxu0 %vm4363_vm0, %v4364_v4 }
 0x44a   :  { %4354 = vpow2.f32 %v2759_v42  ;;  %4044 = vmatprep.subr.mxu0 %v4364_v4 }
 0x454   :  { %v4355_v44 = vpop.eup %4354 }
 0x455   :  { %v3532_v45 = vadd.f32 -1.0, %v4355_v44 }
 0x457   :  { %v2762_v47 = vsel %vm2757_vm8, %v4267_v34, %v3532_v45 }
 0x458   :  { %4035 = vmatmul.mubr.msk.f32.vlgmr.msra.gmra.mrb[18].mxu0 %vm2766_vm4, %v2762_v47 }
 0x459   :  { %4045 = vmatpush3.msra.mxu0 %v3017_v46  ;;  %4046 = vmatprep.mubr.msk.f32.mxu0 %vm4363_vm0, %v4364_v4 }
 0x45a   :  { %4243 = vmatprep.subr.bf16.mxu0 %v4362_v1 }
 0x45c   :  { %4047 = vmatmul.mubr.msk.f32.vlgmr.msra.gmra.mrb[20].mxu0 %vm256_vm2, %v4490_v0 }
 0x45d   :  { %4072 = vmatprep.mubr.msk.f32.mxu0 %vm4363_vm0, %v4364_v4  ;;  %4245 = vmatpush3.bf16.msra.mxu0 %v4244_v5 }
 0x45e   :  { %4246 = vmatprep.subr.bf16.mxu0 %v4362_v1 }
 0x52b   :  { %v3006_v0 = vpop.f32.mrb[18].mxu0 }
 0x52c   :  { %v4268_v53 = vadd.f32 %v3535_v52, %v3006_v0  ;;  %v4036_v54 = vpop.f32.mrb[19].mxu0 }
 0x52e   :  { %v3012_v55 = vmin.f32 %v4268_v53, 0.0  ;;  %vm3011_vm2 = vcmp.gt.f32.partialorder %v4268_v53, 0.0 }
 0x52f   :  { %v3161_v56 = vpop.f32.mrb[20].mxu0 }
 0x530   :  { %v3013_v57 = vmul.f32 1.442695, %v3012_v55  ;;  %v3162_v58 = vadd.f32 %v3161_v56, %v3089_v41  ;;  %v4048_v59 = vpop.f32.mrb[21].mxu0 }
 0x532   :  { %4356 = vpow2.f32 %v3013_v57 }
 0x53c   :  { %v4357_v60 = vpop.eup %4356 }
 0x53d   :  { %v3544_v62 = vadd.f32 -1.0, %v4357_v60 }
 0x53f   :  { %v3016_v63 = vsel %vm3011_vm2, %v4268_v53, %v3544_v62 }
 0x540   :  { %4054 = vmatmul.mubr.msk.f32.vlgmr.msra.gmra.mrb[22].mxu1 %vm81_vm1, %v3016_v63 }
 0x541   :  { %4083 = vmatprep.mubr.msk.f32.mxu1 %vm4363_vm0, %v4364_v4  ;;  %v3258_v4 = vld [vmem:[%s5055_s17 + $0x18] sm:$0xff]  ;;  %vm3270_vm0 = vcmask 523264   ;;  %4257 = vmatpush3.bf16.msra.mxu1 %v4256_v21 }
 0x542   :  { %v4247_v9 = vpack.c.bf16 %v3258_v4, %v3257_v6  ;;  %4258 = vmatprep.subr.bf16.mxu1 %v4362_v1 }
 0x544   :  { %4248 = vmatpush3.bf16.msra.mxu0 %v4247_v9 }
 0x545   :  { %4249 = vmatprep.subr.bf16.mxu0 %v4362_v1  ;;  %4260 = vmatpush3.bf16.msra.mxu1 %v4259_v26 }
 0x548   :  { %4251 = vmatpush3.bf16.msra.mxu0 %v4250_v12 }
 0x549   :  { %4252 = vmatprep.subr.bf16.mxu0 %v4362_v1 }
 0x54c   :  { %4254 = vmatpush3.bf16.msra.mxu0 %v4253_v15 }
 0x613   :  { %v3236_v22 = vpop.f32.mrb[22].mxu1 }
 0x614   :  { %v3240_v14 = vadd.f32 %v3236_v22, %v3162_v58  ;;  %v4055_v17 = vpop.f32.mrb[23].mxu1 }
 0x616   :  { %v3248_v25 = vadd.f32 %v3548_v35, %v3240_v14 }
 0x618   :  { %v3250_v51 = vmin.f32 %v3248_v25, 0.0  ;;  %vm3249_vm1 = vcmp.gt.f32.partialorder %v3248_v25, 0.0 }
 0x61a   :  { %v3251_v18 = vmul.f32 1.442695, %v3250_v51 }
 0x61c   :  { %4358 = vpow2.f32 %v3251_v18 }
 0x626   :  { %v4359_v61 = vpop.eup %4358 }
 0x627   :  { %v3549_v19 = vadd.f32 -1.0, %v4359_v61 }
 0x629   :  { %v3254_v8 = vsel %vm3249_vm1, %v3248_v25, %v3549_v19 }
 0x62a   :  { %4073 = vmatmul.mubr.msk.f32.vlgmr.msra.gmra.mrb[22].mxu0 %vm3270_vm0, %v3254_v8 }
 0x6fd   :  { %v3340_v28 = vpop.f32.mrb[22].mxu0 }
 0x6fe   :  { %v3341_v29 = vadd.f32 %v3550_v27, %v3340_v28  ;;  %v4074_v30 = vpop.f32.mrb[23].mxu0 }
 0x700   :  { %v3345_v31 = vmin.f32 %v3341_v29, 0.0  ;;  %vm3344_vm5 = vcmp.gt.f32.partialorder %v3341_v29, 0.0 }
 0x702   :  { %v3346_v32 = vmul.f32 1.442695, %v3345_v31 }
 0x704   :  { %4360 = vpow2.f32 %v3346_v32 }
 0x70e   :  { %v4361_v1 = vpop.eup %4360 }
 0x70f   :  { %v3552_v33 = vadd.f32 -1.0, %v4361_v1 }
 0x711   :  { %v3349_v34 = vsel %vm3344_vm5, %v3341_v29, %v3552_v33 }
 0x712   :  { %4084 = vmatmul.mubr.msk.f32.vlgmr.msra.gmra.mrb[24].mxu1 %vm171_vm6, %v3349_v34 }
 0x7e5   :  { %v3430_v37 = vpop.f32.mrb[24].mxu1 }
 0x7e6   :  { %v3431_v38 = vadd.f32 %v3553_v36, %v3430_v37  ;;  %v4085_v39 = vpop.f32.mrb[25].mxu1 }
 0x7e8   :  { %3434 = vst [vmem:[%s5060_s21] sm:$0xff] %v3431_v38 }

</bundles_post_ra>
